<compile_context>
chip_gen: v7x
topology: tpu7x:2x2x1
jax: 0.10.0
libtpu: 0.0.40
codegen_flags: <defaults>
</compile_context>

<pallas_src>
import jax
import jax.numpy as jnp
from jax.experimental import pallas as pl
from jax.experimental.pallas import tpu as pltpu

# Model constants implied by the PyTorch module:
#   Conv1d(in=50, out=50, k=3, pad=0) applied twice (shared weights),
#   then Dropout(0.2) + Linear(196, 1)
#   => seq_len (= conv "channel" axis) = 50, embed_len = 200 (200-2-2 = 196)
SEQ_LEN = 50          # tokens per example; conv channel axis
EMBED_LEN = 200       # embedding width; conv length axis
KSIZE = 3
L1 = EMBED_LEN - (KSIZE - 1)       # 198 after first conv
L2 = L1 - (KSIZE - 1)              # 196 after second conv (== Linear in-dim)
SEG = 256                          # lane-aligned padded segment width per batch
VOCAB = 100
BATCH = 2


def cnn_kernel(x_ref, w_ref, b_ref, s_ref, bl_ref, o_ref):
    """Whole-batch, single-invocation kernel.

    x_ref : (50, B*SEG) f32 VMEM  batch-stacked embeddings (zero-padded segments)
    w_ref : (3, 50, 50) f32 VMEM  conv weight, tap-major (k, out, in)
    b_ref : (50, 1)     f32 VMEM  conv bias column (broadcast along lanes)
    s_ref : (B*SEG, B)  f32 VMEM  block-diag selector carrying Linear(196->1) weights
    bl_ref: (1,)        f32 SMEM  linear bias scalar
    o_ref : (50, B)     f32 VMEM  output logits per (channel, batch)
    """
    n = x_ref.shape[1]                 # static: B*SEG
    x = x_ref[...]                     # (50, B*SEG)
    w0 = w_ref[0]                      # (50, 50)
    w1 = w_ref[1]
    w2 = w_ref[2]
    b = b_ref[...]                     # (50, 1)

    def conv(v):
        # Valid conv as 3 full-width matmuls (K=50, N=B*SEG) combined with XLU
        # lane rolls instead of unaligned shifted slices.  Columns in the
        # padded tail of each 256-wide segment become garbage but are never
        # selected by the final selector matmul.
        z0 = jnp.dot(w0, v, preferred_element_type=jnp.float32)
        z1 = jnp.dot(w1, v, preferred_element_type=jnp.float32)
        z2 = jnp.dot(w2, v, preferred_element_type=jnp.float32)
        return (z0
                + pltpu.roll(z1, shift=n - 1, axis=1)   # == shift by -1
                + pltpu.roll(z2, shift=n - 2, axis=1)   # == shift by -2
                + b)

    y1 = jnp.maximum(conv(x), 0.0)     # Conv1d + ReLU
    y2 = conv(y1)                      # Conv1d again (shared weights), no activation

    # Dropout(0.2) is identity at inference.
    # TODO(synk): training-mode dropout (stochastic mask) not implemented.

    # Linear(196 -> 1) + per-batch segmented reduction fused into one matmul
    # against the block-diagonal selector (zeros outside each valid segment).
    out = jnp.dot(y2, s_ref[...], preferred_element_type=jnp.float32) + bl_ref[0]
    o_ref[...] = out                   # (50, B)


@jax.jit
def cnn_forward(x_idx, embed_mat, conv_w, conv_b, lin_w, lin_b):
    """x_idx: (B, 50) int32 token ids. Returns (B, 50, 1) float32."""
    B = x_idx.shape[0]
    nlanes = B * SEG

    # Embedding lookup (plain JAX gather glue, fused by XLA around the kernel).
    # TODO(synk): in-kernel embedding gather (dynamic row indices) not implemented.
    x_emb = jnp.take(embed_mat, x_idx, axis=0).astype(jnp.float32)       # (B,50,200)
    x_emb = jnp.transpose(x_emb, (1, 0, 2))                              # (50,B,200)
    x_emb = jnp.pad(x_emb, ((0, 0), (0, 0), (0, SEG - EMBED_LEN)))       # (50,B,SEG)
    x_slab = x_emb.reshape(SEQ_LEN, nlanes)                              # (50,B*SEG)

    # Conv weight (out=50, in=50, k=3) -> tap-major (3, 50, 50)
    w_taps = jnp.transpose(conv_w, (2, 0, 1)).astype(jnp.float32)
    b_col = conv_b.reshape(SEQ_LEN, 1).astype(jnp.float32)

    # Block-diagonal selector: sel[b*SEG + j, b] = lin_w[j] for j < 196, else 0.
    lw_pad = jnp.pad(lin_w.reshape(L2).astype(jnp.float32), (0, SEG - L2))   # (SEG,)
    sel = (lw_pad[None, :, None]
           * jnp.eye(B, dtype=jnp.float32)[:, None, :]).reshape(nlanes, B)   # (B*SEG,B)
    bl = lin_b.reshape(1).astype(jnp.float32)                                # (1,)

    out2d = pl.pallas_call(
        cnn_kernel,
        out_shape=jax.ShapeDtypeStruct((SEQ_LEN, B), jnp.float32),
        in_specs=[
            pl.BlockSpec(memory_space=pltpu.MemorySpace.VMEM),   # x slab
            pl.BlockSpec(memory_space=pltpu.MemorySpace.VMEM),   # conv weight taps
            pl.BlockSpec(memory_space=pltpu.MemorySpace.VMEM),   # conv bias column
            pl.BlockSpec(memory_space=pltpu.MemorySpace.VMEM),   # selector (linear w)
            pl.BlockSpec(memory_space=pltpu.MemorySpace.SMEM),   # linear bias scalar
        ],
        out_specs=pl.BlockSpec(memory_space=pltpu.MemorySpace.VMEM),
    )(x_slab, w_taps, b_col, sel, bl)

    return jnp.transpose(out2d).reshape(B, SEQ_LEN, 1)


def reference_forward(x_idx, embed_mat, conv_w, conv_b, lin_w, lin_b):
    """Pure-JAX reference mirroring the PyTorch forward (eval mode)."""
    x = jnp.take(embed_mat, x_idx, axis=0).astype(jnp.float32)   # (B, 50, 200)

    def conv1d(inp):  # inp: (B, 50, L) -> (B, 50, L-2)
        Lout = inp.shape[-1] - (KSIZE - 1)
        out = jnp.zeros(inp.shape[:2] + (Lout,), jnp.float32)
        for k in range(KSIZE):
            out = out + jnp.einsum(
                "oc,bcl->bol", conv_w[:, :, k], inp[:, :, k:k + Lout])
        return out + conv_b[None, :, None]

    y1 = jnp.maximum(conv1d(x), 0.0)
    y2 = conv1d(y1)                                              # (B, 50, 196)
    return jnp.einsum("bcl,ol->bco", y2, lin_w) + lin_b          # (B, 50, 1)


if __name__ == "__main__":
    key = jax.random.PRNGKey(0)
    k_emb, k_cw, k_cb, k_lw, k_lb, k_x = jax.random.split(key, 6)

    # Deterministic synthetic parameters (shapes from the module __init__).
    embed_mat = jax.random.normal(k_emb, (VOCAB, EMBED_LEN), jnp.float32) * 0.1
    conv_w = jax.random.normal(k_cw, (SEQ_LEN, SEQ_LEN, KSIZE), jnp.float32) * 0.08
    conv_b = jax.random.normal(k_cb, (SEQ_LEN,), jnp.float32) * 0.05
    lin_w = jax.random.normal(k_lw, (1, L2), jnp.float32) * 0.07
    lin_b = jax.random.normal(k_lb, (1,), jnp.float32) * 0.05

    x_idx = jax.random.randint(k_x, (BATCH, SEQ_LEN), 0, VOCAB, jnp.int32)

    out = cnn_forward(x_idx, embed_mat, conv_w, conv_b, lin_w, lin_b)
    out = jax.block_until_ready(out)

    ref = reference_forward(x_idx, embed_mat, conv_w, conv_b, lin_w, lin_b)
    assert out.shape == (BATCH, SEQ_LEN, 1)
    assert jnp.allclose(out, ref, atol=2e-2, rtol=2e-2), "mismatch vs reference"

    print("KERNEL_OK")
</pallas_src>

<mosaic_0001>
module attributes {stable_mosaic.version = 11 : i64} {
  func.func @cnn_kernel(%arg0: memref<50x512xf32, #tpu.memory_space<vmem>>, %arg1: memref<3x50x50xf32, #tpu.memory_space<vmem>>, %arg2: memref<50x1xf32, #tpu.memory_space<vmem>>, %arg3: memref<512x2xf32, #tpu.memory_space<vmem>>, %arg4: memref<1xf32, #tpu.memory_space<smem>>, %arg5: memref<50x2xf32, #tpu.memory_space<vmem>>) attributes {dimension_semantics = [], scalar_prefetch = 0 : i64, scratch_operands = 0 : i64, tpu.core_type = #tpu.core_type<tc>} {
    %c0 = arith.constant 0 : index
    %c0_0 = arith.constant 0 : index
    %0 = vector.load %arg0[%c0, %c0_0] : memref<50x512xf32, #tpu.memory_space<vmem>>, vector<50x512xf32>
    %c0_1 = arith.constant 0 : index
    %c0_2 = arith.constant 0 : index
    %c0_3 = arith.constant 0 : index
    %1 = vector.load %arg1[%c0_1, %c0_2, %c0_3] : memref<3x50x50xf32, #tpu.memory_space<vmem>>, vector<1x50x50xf32>
    %2 = vector.shape_cast %1 : vector<1x50x50xf32> to vector<50x50xf32>
    %c1 = arith.constant 1 : index
    %c0_4 = arith.constant 0 : index
    %c0_5 = arith.constant 0 : index
    %3 = vector.load %arg1[%c1, %c0_4, %c0_5] : memref<3x50x50xf32, #tpu.memory_space<vmem>>, vector<1x50x50xf32>
    %4 = vector.shape_cast %3 : vector<1x50x50xf32> to vector<50x50xf32>
    %c2 = arith.constant 2 : index
    %c0_6 = arith.constant 0 : index
    %c0_7 = arith.constant 0 : index
    %5 = vector.load %arg1[%c2, %c0_6, %c0_7] : memref<3x50x50xf32, #tpu.memory_space<vmem>>, vector<1x50x50xf32>
    %6 = vector.shape_cast %5 : vector<1x50x50xf32> to vector<50x50xf32>
    %c0_8 = arith.constant 0 : index
    %c0_9 = arith.constant 0 : index
    %7 = vector.load %arg2[%c0_8, %c0_9] : memref<50x1xf32, #tpu.memory_space<vmem>>, vector<50x1xf32>
    %cst = arith.constant dense<0.000000e+00> : vector<50x512xf32>
    %8 = tpu.matmul %2, %0, %cst {dimension_numbers = #tpu.dot_dimension_numbers<[1], [0], [0], [1], [0, 0, 1, 1], [], []>} : vector<50x50xf32>, vector<50x512xf32>, vector<50x512xf32> -> vector<50x512xf32>
    %cst_10 = arith.constant dense<0.000000e+00> : vector<50x512xf32>
    %9 = tpu.matmul %4, %0, %cst_10 {dimension_numbers = #tpu.dot_dimension_numbers<[1], [0], [0], [1], [0, 0, 1, 1], [], []>} : vector<50x50xf32>, vector<50x512xf32>, vector<50x512xf32> -> vector<50x512xf32>
    %cst_11 = arith.constant dense<0.000000e+00> : vector<50x512xf32>
    %10 = tpu.matmul %6, %0, %cst_11 {dimension_numbers = #tpu.dot_dimension_numbers<[1], [0], [0], [1], [0, 0, 1, 1], [], []>} : vector<50x50xf32>, vector<50x512xf32>, vector<50x512xf32> -> vector<50x512xf32>
    %c511_i32 = arith.constant 511 : i32
    %11 = tpu.dynamic_rotate %9 by %c511_i32 dim 1 : vector<50x512xf32>, i32 -> vector<50x512xf32>
    %12 = arith.addf %8, %11 : vector<50x512xf32>
    %c510_i32 = arith.constant 510 : i32
    %13 = tpu.dynamic_rotate %10 by %c510_i32 dim 1 : vector<50x512xf32>, i32 -> vector<50x512xf32>
    %14 = arith.addf %12, %13 : vector<50x512xf32>
    %15 = vector.broadcast %7 : vector<50x1xf32> to vector<50x512xf32>
    %16 = arith.addf %14, %15 : vector<50x512xf32>
    %cst_12 = arith.constant 0.000000e+00 : f32
    %17 = vector.broadcast %cst_12 : f32 to vector<50x512xf32>
    %18 = arith.maximumf %16, %17 : vector<50x512xf32>
    %cst_13 = arith.constant dense<0.000000e+00> : vector<50x512xf32>
    %19 = tpu.matmul %2, %18, %cst_13 {dimension_numbers = #tpu.dot_dimension_numbers<[1], [0], [0], [1], [0, 0, 1, 1], [], []>} : vector<50x50xf32>, vector<50x512xf32>, vector<50x512xf32> -> vector<50x512xf32>
    %cst_14 = arith.constant dense<0.000000e+00> : vector<50x512xf32>
    %20 = tpu.matmul %4, %18, %cst_14 {dimension_numbers = #tpu.dot_dimension_numbers<[1], [0], [0], [1], [0, 0, 1, 1], [], []>} : vector<50x50xf32>, vector<50x512xf32>, vector<50x512xf32> -> vector<50x512xf32>
    %cst_15 = arith.constant dense<0.000000e+00> : vector<50x512xf32>
    %21 = tpu.matmul %6, %18, %cst_15 {dimension_numbers = #tpu.dot_dimension_numbers<[1], [0], [0], [1], [0, 0, 1, 1], [], []>} : vector<50x50xf32>, vector<50x512xf32>, vector<50x512xf32> -> vector<50x512xf32>
    %c511_i32_16 = arith.constant 511 : i32
    %22 = tpu.dynamic_rotate %20 by %c511_i32_16 dim 1 : vector<50x512xf32>, i32 -> vector<50x512xf32>
    %23 = arith.addf %19, %22 : vector<50x512xf32>
    %c510_i32_17 = arith.constant 510 : i32
    %24 = tpu.dynamic_rotate %21 by %c510_i32_17 dim 1 : vector<50x512xf32>, i32 -> vector<50x512xf32>
    %25 = arith.addf %23, %24 : vector<50x512xf32>
    %26 = vector.broadcast %7 : vector<50x1xf32> to vector<50x512xf32>
    %27 = arith.addf %25, %26 : vector<50x512xf32>
    %c0_18 = arith.constant 0 : index
    %c0_19 = arith.constant 0 : index
    %28 = vector.load %arg3[%c0_18, %c0_19] : memref<512x2xf32, #tpu.memory_space<vmem>>, vector<512x2xf32>
    %cst_20 = arith.constant dense<0.000000e+00> : vector<50x2xf32>
    %29 = tpu.matmul %27, %28, %cst_20 {dimension_numbers = #tpu.dot_dimension_numbers<[1], [0], [0], [1], [0, 0, 1, 1], [], []>} : vector<50x512xf32>, vector<512x2xf32>, vector<50x2xf32> -> vector<50x2xf32>
    %c0_21 = arith.constant 0 : index
    %30 = memref.load %arg4[%c0_21] : memref<1xf32, #tpu.memory_space<smem>>
    %31 = vector.broadcast %30 : f32 to vector<50x2xf32>
    %32 = arith.addf %29, %31 : vector<50x2xf32>
    %c0_22 = arith.constant 0 : index
    %c0_23 = arith.constant 0 : index
    %33 = vector.load %arg5[%c0_22, %c0_23] : memref<50x2xf32, #tpu.memory_space<vmem>>, vector<50x2xf32>
    tpu.vector_store %arg5[%c0_22, %c0_23], %32 {strides = array<i32>} : memref<50x2xf32, #tpu.memory_space<vmem>>, vector<50x2xf32>,
    return
  }
}

</mosaic_0001>

<bundles_post_ra>
// kernel: cnn_forward.1
= control target key start
LH: loop header
LB: loop body
LE: loop exit
PB: predicated region body
PF: predicated region fallthrough
CT: control target
= control target key end

     0   :  { %v4442_v3 = vmov 0.0   ;;  %v2710_v8 = vmov 0   ;;  %vm101_vm0 = vcmask 1041408   ;;  %vm79_vm1 = vcmask 408576   ;;  %s2711_s26 = smov 127   ;;  %s2712_s27 = smov 126   ;;  %s4436_s0 = inlined_call_operand.vmem [shape: f32[50,512], index: 0, kind: input, shape index: {}]   ;;  %s4437_s1 = inlined_call_operand.vmem [shape: f32[3,50,50], index: 1, kind: input, shape index: {}]   ;;  %s4438_s2 = inlined_call_operand.vmem [shape: f32[50,1], index: 2, kind: input, shape index: {}]   ;;  %s4439_s3 = inlined_call_operand.vmem [shape: f32[512,2], index: 3, kind: input, shape index: {}]   ;;  %s4440_s4 = inlined_call_operand.<no memory space> [shape: f32[1], index: 4, kind: input, shape index: {}]   ;;  %s4441_s5 = inlined_call_operand.vmem [shape: f32[50,2], index: 5, kind: output, shape index: {}]  }
   0x1   :  { %v22_v0 = vld [vmem:[%s4436_s0 + $0x8] sm:$0xff]  ;;  %v24_v2 = vld [vmem:[%s4436_s0 + $0x18] sm:$0xff]  ;;  %178 = vmatprep.mubr.f32.mxu0 %v4442_v3  ;;  %285 = vmatprep.mubr.f32.mxu1 %v4442_v3  ;;  %v21_v6 = vld [vmem:[%s4436_s0] sm:$0xff]  ;;  %vm2233_vm4 = vcmask 15360   ;;  %vm2240_vm5 = vcmask 9216  }
   0x2   :  { %v26_v1 = vld [vmem:[%s4436_s0 + $0x28] sm:$0xff]  ;;  %v28_v5 = vld [vmem:[%s4436_s0 + $0x38] sm:$0xff]  ;;  %v25_v7 = vld [vmem:[%s4436_s0 + $0x20] sm:$0xff]  ;;  %2686 = vset.pattern.permute.xlu0 %v2710_v8  ;;  %2687 = vset.pattern.permute.xlu1 %v2710_v8 }
   0x3   :  { %v2754_v4 = vpack.c.bf16 %v26_v1, %v22_v0  ;;  %v2765_v9 = vpack.c.bf16 %v28_v5, %v24_v2  ;;  %v2767_v10 = vpack.c.bf16 %v25_v7, %v21_v6  ;;  %v23_v11 = vld [vmem:[%s4436_s0 + $0x10] sm:$0xff]  ;;  %v30_v13 = vld [vmem:[%s4436_s0 + $0x48] sm:$0xff]  ;;  %v32_v16 = vld [vmem:[%s4436_s0 + $0x58] sm:$0xff] }
   0x4   :  { %v27_v12 = vld [vmem:[%s4436_s0 + $0x30] sm:$0xff]  ;;  %v34_v15 = vld [vmem:[%s4436_s0 + $0x68] sm:$0xff]  ;;  %v36_v17 = vld [vmem:[%s4436_s0 + $0x78] sm:$0xff] }
   0x5   :  { %2475 = vmatprep.subr.bf16.mxu0 %v2754_v4  ;;  %v2779_v14 = vpack.c.bf16 %v27_v12, %v23_v11  ;;  %2487 = vmatprep.subr.bf16.mxu1 %v2765_v9  ;;  %v2792_v18 = vpack.c.bf16 %v34_v15, %v30_v13  ;;  %v2794_v19 = vpack.c.bf16 %v36_v17, %v32_v16  ;;  %v29_v20 = vld [vmem:[%s4436_s0 + $0x40] sm:$0xff]  ;;  %v31_v22 = vld [vmem:[%s4436_s0 + $0x50] sm:$0xff]  ;;  %v38_v25 = vld [vmem:[%s4436_s0 + $0x88] sm:$0xff] }
   0x6   :  { %2477 = vmatpush1.bf16.msra.mxu0 %v2767_v10  ;;  %v33_v21 = vld [vmem:[%s4436_s0 + $0x60] sm:$0xff]  ;;  %v35_v24 = vld [vmem:[%s4436_s0 + $0x70] sm:$0xff]  ;;  %v42_v26 = vld [vmem:[%s4436_s0 + $0xa8] sm:$0xff] }
   0x7   :  { %2489 = vmatpush1.bf16.msra.mxu1 %v2779_v14  ;;  %v2806_v23 = vpack.c.bf16 %v33_v21, %v29_v20  ;;  %2479 = vmatprep.subr.bf16.mxu0 %v2792_v18  ;;  %v2819_v27 = vpack.c.bf16 %v35_v24, %v31_v22  ;;  %v2821_v28 = vpack.c.bf16 %v42_v26, %v38_v25  ;;  %v40_v29 = vld [vmem:[%s4436_s0 + $0x98] sm:$0xff]  ;;  %v37_v31 = vld [vmem:[%s4436_s0 + $0x80] sm:$0xff]  ;;  %v39_v34 = vld [vmem:[%s4436_s0 + $0x90] sm:$0xff] }
   0x8   :  { %2491 = vmatprep.subr.bf16.mxu1 %v2794_v19  ;;  %v44_v30 = vld [vmem:[%s4436_s0 + $0xb8] sm:$0xff]  ;;  %v41_v33 = vld [vmem:[%s4436_s0 + $0xa0] sm:$0xff]  ;;  %v43_v35 = vld [vmem:[%s4436_s0 + $0xb0] sm:$0xff] }
   0x9   :  { %v2832_v32 = vpack.c.bf16 %v44_v30, %v40_v29  ;;  %v2844_v36 = vpack.c.bf16 %v41_v33, %v37_v31  ;;  %v2848_v37 = vpack.c.bf16 %v43_v35, %v39_v34  ;;  %v2854_v38 = vld [vmem:[%s4436_s0 + $0xc8] sm:$0x3]  ;;  %v2859_v39 = vld [vmem:[%s4436_s0 + $0xd8] sm:$0x3]  ;;  %v2868_v40 = vld [vmem:[%s4436_s0 + $0xc0] sm:$0x3] }
   0xa   :  { %2481 = vmatpush1.bf16.msra.mxu0 %v2806_v23  ;;  %v2875_v41 = vld [vmem:[%s4436_s0 + $0xd0] sm:$0x3]  ;;  %v2246_v42 = vld [vmem:[%s4437_s1 + $0x38] sm:$0xff]  ;;  %v2247_v43 = vld [vmem:[%s4437_s1 + $0x40] sm:$0xff] }
   0xb   :  { %2493 = vmatpush1.bf16.msra.mxu1 %v2819_v27  ;;  %2483 = vmatprep.subr.bf16.mxu0 %v2821_v28  ;;  %v2248_v44 = vld [vmem:[%s4437_s1 + $0x48] sm:$0xff]  ;;  %v2249_v45 = vld [vmem:[%s4437_s1 + $0x50] sm:$0xff]  ;;  %v2250_v46 = vld [vmem:[%s4437_s1 + $0x58] sm:$0xff] }
   0xc   :  { %2495 = vmatprep.subr.bf16.mxu1 %v2832_v32  ;;  %v72_v47 = vld [vmem:[%s4438_s2] sm:$0xff]  ;;  %v75_v48 = vld [vmem:[%s4438_s2 + $0x18] sm:$0xff]  ;;  %v73_v50 = vld [vmem:[%s4438_s2 + $0x8] sm:$0xff] }
   0xd   :  { %v2251_v49 = vld [vmem:[%s4437_s1 + $0x60] sm:$0xff]  ;;  %1000 = vperm.xlu0 %2686, %v72_v47   ;;  %1015 = vperm.xlu1 %2687, %v75_v48   ;;  %v77_v51 = vld [vmem:[%s4438_s2 + $0x28] sm:$0xff]  ;;  %v74_v53 = vld [vmem:[%s4438_s2 + $0x10] sm:$0xff] }
   0xe   :  { %2485 = vmatpush1.bf16.msra.mxu0 %v2844_v36  ;;  %v2252_v52 = vld [vmem:[%s4437_s1 + $0x68] sm:$0x3]  ;;  %v2253_v54 = vld [vmem:[%s4437_s1 + $0x70] sm:$0xff]  ;;  %v2254_v55 = vld [vmem:[%s4437_s1 + $0x78] sm:$0xff] }
   0xf   :  { %2497 = vmatpush1.bf16.msra.mxu1 %v2848_v37  ;;  %2260 = vmatprep.subr.msk.mxu0 %vm101_vm0, %v2854_v38  ;;  %v2255_v56 = vld [vmem:[%s4437_s1 + $0x80] sm:$0xff]  ;;  %v2256_v57 = vld [vmem:[%s4437_s1 + $0x88] sm:$0xff]  ;;  %v2257_v59 = vld [vmem:[%s4437_s1 + $0x90] sm:$0xff] }
  0x10   :  { %2269 = vmatprep.subr.msk.mxu1 %vm101_vm0, %v2859_v39  ;;  %v76_v58 = vld [vmem:[%s4438_s2 + $0x20] sm:$0xff]  ;;  %v78_v60 = vld [vmem:[%s4438_s2 + $0x30] sm:$0x3]  ;;  %v2258_v61 = vld [vmem:[%s4437_s1 + $0x98] sm:$0xff] }
  0x11   :  { %1005 = vperm.xlu0 %2686, %v73_v50   ;;  %1025 = vperm.xlu1 %2687, %v77_v51   ;;  %v2259_v62 = vld [vmem:[%s4437_s1 + $0xa0] sm:$0x3]  ;;  %v50_v0 = vld [vmem:[%s4437_s1 + $0x8] sm:$0xff]  ;;  %v51_v1 = vld [vmem:[%s4437_s1 + $0x10] sm:$0xff] }
  0x12   :  { %2261 = vmatpush1.msk.msra.mxu0 %vm101_vm0, %v2868_v40  ;;  %v49_v63 = vld [vmem:[%s4437_s1] sm:$0xff]  ;;  %v52_v2 = vld [vmem:[%s4437_s1 + $0x18] sm:$0xff]  ;;  %v54_v5 = vld [vmem:[%s4437_s1 + $0x28] sm:$0xff] }
  0x13   :  { %2270 = vmatpush1.msk.msra.mxu1 %vm101_vm0, %v2875_v41  ;;  %2262 = vmatmul.mubr.msk.f32.vlgmr.msra.gmra.mrb[0].mxu0 %vm79_vm1, %v2246_v42  ;;  %v55_v6 = vld [vmem:[%s4437_s1 + $0x30] sm:$0x3] }
  0x14   :  { %2271 = vmatmul.mubr.msk.f32.vlgmr.msra.gmra.mrb[0].mxu1 %vm79_vm1, %v2246_v42  ;;  %184 = vmatprep.mubr.f32.mxu0 %v4442_v3 }
  0x15   :  { %291 = vmatprep.mubr.f32.mxu1 %v4442_v3  ;;  %2511 = vmatprep.subr.bf16.mxu1 %v2765_v9 }
  0x16   :  { %2513 = vmatpush1.bf16.msra.mxu1 %v2779_v14  ;;  %2499 = vmatprep.subr.bf16.mxu0 %v2754_v4 }
  0x17   :  { %2263 = vmatmul.mubr.msk.f32.gmra.mrb[2].mxu0 %vm79_vm1, %v2247_v43  ;;  %2515 = vmatprep.subr.bf16.mxu1 %v2794_v19 }
  0x18   :  { %2272 = vmatmul.mubr.msk.f32.gmra.mrb[2].mxu1 %vm79_vm1, %v2247_v43  ;;  %190 = vmatprep.mubr.f32.mxu0 %v4442_v3 }
  0x19   :  { %297 = vmatprep.mubr.f32.mxu1 %v4442_v3  ;;  %2501 = vmatpush1.bf16.msra.mxu0 %v2767_v10 }
  0x1a   :  { %2517 = vmatpush1.bf16.msra.mxu1 %v2819_v27  ;;  %2503 = vmatprep.subr.bf16.mxu0 %v2792_v18 }
  0x1b   :  { %2264 = vmatmul.mubr.msk.f32.gmra.mrb[4].mxu0 %vm79_vm1, %v2248_v44  ;;  %2519 = vmatprep.subr.bf16.mxu1 %v2832_v32 }
  0x1c   :  { %2273 = vmatmul.mubr.msk.f32.gmra.mrb[4].mxu1 %vm79_vm1, %v2248_v44  ;;  %196 = vmatprep.mubr.f32.mxu0 %v4442_v3 }
  0x1d   :  { %303 = vmatprep.mubr.f32.mxu1 %v4442_v3  ;;  %2505 = vmatpush1.bf16.msra.mxu0 %v2806_v23 }
  0x1e   :  { %2521 = vmatpush1.bf16.msra.mxu1 %v2848_v37  ;;  %2507 = vmatprep.subr.bf16.mxu0 %v2821_v28 }
  0x1f   :  { %2265 = vmatmul.mubr.msk.f32.gmra.mrb[6].mxu0 %vm79_vm1, %v2249_v45  ;;  %2287 = vmatprep.subr.msk.mxu1 %vm101_vm0, %v2859_v39 }
  0x20   :  { %2274 = vmatmul.mubr.msk.f32.gmra.mrb[6].mxu1 %vm79_vm1, %v2249_v45  ;;  %202 = vmatprep.mubr.f32.mxu0 %v4442_v3 }
  0x21   :  { %309 = vmatprep.mubr.f32.mxu1 %v4442_v3  ;;  %2509 = vmatpush1.bf16.msra.mxu0 %v2844_v36 }
  0x22   :  { %2288 = vmatpush1.msk.msra.mxu1 %vm101_vm0, %v2875_v41  ;;  %2278 = vmatprep.subr.msk.mxu0 %vm101_vm0, %v2854_v38 }
  0x23   :  { %2266 = vmatmul.mubr.msk.f32.gmra.mrb[8].mxu0 %vm79_vm1, %v2250_v46  ;;  %2535 = vmatprep.subr.bf16.mxu1 %v2765_v9 }
  0x24   :  { %2275 = vmatmul.mubr.msk.f32.gmra.mrb[8].mxu1 %vm79_vm1, %v2250_v46  ;;  %208 = vmatprep.mubr.f32.mxu0 %v4442_v3 }
  0x25   :  { %315 = vmatprep.mubr.f32.mxu1 %v4442_v3  ;;  %2279 = vmatpush1.msk.msra.mxu0 %vm101_vm0, %v2868_v40 }
  0x26   :  { %2523 = vmatprep.subr.bf16.mxu0 %v2754_v4  ;;  %1010 = vperm.xlu0 %2686, %v74_v53   ;;  %v53_v4 = vld [vmem:[%s4437_s1 + $0x20] sm:$0xff] }
  0x27   :  { %2267 = vmatmul.mubr.msk.f32.gmra.mrb[10].mxu0 %vm79_vm1, %v2251_v49 }
  0x28   :  { %2276 = vmatmul.mubr.msk.f32.gmra.mrb[10].mxu1 %vm79_vm1, %v2251_v49  ;;  %214 = vmatprep.mubr.f32.mxu0 %v4442_v3 }
  0x29   :  { %321 = vmatprep.mubr.f32.mxu1 %v4442_v3 }
  0x2a   :  { %1020 = vperm.xlu0 %2686, %v76_v58  }
  0x2b   :  { %2268 = vmatmul.mubr.msk.f32.gmra.mrb[12].mxu0 %vm79_vm1, %v2252_v52 }
  0x2c   :  { %2277 = vmatmul.mubr.msk.f32.gmra.mrb[12].mxu1 %vm79_vm1, %v2252_v52  ;;  %413 = vmatprep.mubr.f32.mxu0 %v4442_v3 }
  0x2d   :  { %520 = vmatprep.mubr.f32.mxu1 %v4442_v3 }
  0x2e   :  { %1030 = vperm.xlu0 %2686, %v78_v60  }
  0x2f   :  { %2280 = vmatmul.mubr.msk.f32.vlgmr.msra.gmra.mrb[14].mxu0 %vm79_vm1, %v2253_v54 }
  0x30   :  { %2289 = vmatmul.mubr.msk.f32.vlgmr.msra.gmra.mrb[14].mxu1 %vm79_vm1, %v2253_v54  ;;  %419 = vmatprep.mubr.f32.mxu0 %v4442_v3 }
  0x31   :  { %526 = vmatprep.mubr.f32.mxu1 %v4442_v3  ;;  %2525 = vmatpush1.bf16.msra.mxu0 %v2767_v10 }
  0x32   :  { %2527 = vmatprep.subr.bf16.mxu0 %v2792_v18  ;;  %2537 = vmatpush1.bf16.msra.mxu1 %v2779_v14 }
  0x33   :  { %2281 = vmatmul.mubr.msk.f32.gmra.mrb[16].mxu0 %vm79_vm1, %v2254_v55  ;;  %2539 = vmatprep.subr.bf16.mxu1 %v2794_v19 }
  0x34   :  { %2290 = vmatmul.mubr.msk.f32.gmra.mrb[16].mxu1 %vm79_vm1, %v2254_v55  ;;  %425 = vmatprep.mubr.f32.mxu0 %v4442_v3 }
  0x35   :  { %532 = vmatprep.mubr.f32.mxu1 %v4442_v3  ;;  %2529 = vmatpush1.bf16.msra.mxu0 %v2806_v23 }
  0x36   :  { %2531 = vmatprep.subr.bf16.mxu0 %v2821_v28  ;;  %2541 = vmatpush1.bf16.msra.mxu1 %v2819_v27 }
  0x37   :  { %2282 = vmatmul.mubr.msk.f32.gmra.mrb[18].mxu0 %vm79_vm1, %v2255_v56  ;;  %2543 = vmatprep.subr.bf16.mxu1 %v2832_v32 }
  0x38   :  { %2291 = vmatmul.mubr.msk.f32.gmra.mrb[18].mxu1 %vm79_vm1, %v2255_v56  ;;  %431 = vmatprep.mubr.f32.mxu0 %v4442_v3 }
  0x39   :  { %538 = vmatprep.mubr.f32.mxu1 %v4442_v3  ;;  %2533 = vmatpush1.bf16.msra.mxu0 %v2844_v36 }
  0x3a   :  { %2296 = vmatprep.subr.msk.mxu0 %vm101_vm0, %v2854_v38  ;;  %2545 = vmatpush1.bf16.msra.mxu1 %v2848_v37 }
  0x3b   :  { %2283 = vmatmul.mubr.msk.f32.gmra.mrb[20].mxu0 %vm79_vm1, %v2256_v57  ;;  %2305 = vmatprep.subr.msk.mxu1 %vm101_vm0, %v2859_v39 }
  0x3c   :  { %2292 = vmatmul.mubr.msk.f32.gmra.mrb[20].mxu1 %vm79_vm1, %v2256_v57  ;;  %437 = vmatprep.mubr.f32.mxu0 %v4442_v3 }
  0x3d   :  { %544 = vmatprep.mubr.f32.mxu1 %v4442_v3  ;;  %2297 = vmatpush1.msk.msra.mxu0 %vm101_vm0, %v2868_v40 }
  0x3e   :  { %2306 = vmatpush1.msk.msra.mxu1 %vm101_vm0, %v2875_v41 }
  0x3f   :  { %2284 = vmatmul.mubr.msk.f32.gmra.mrb[22].mxu0 %vm79_vm1, %v2257_v59 }
  0x40   :  { %2293 = vmatmul.mubr.msk.f32.gmra.mrb[22].mxu1 %vm79_vm1, %v2257_v59  ;;  %443 = vmatprep.mubr.f32.mxu0 %v4442_v3 }
  0x41   :  { %550 = vmatprep.mubr.f32.mxu1 %v4442_v3 }
  0x43   :  { %2285 = vmatmul.mubr.msk.f32.gmra.mrb[24].mxu0 %vm79_vm1, %v2258_v61 }
  0x44   :  { %2294 = vmatmul.mubr.msk.f32.gmra.mrb[24].mxu1 %vm79_vm1, %v2258_v61  ;;  %449 = vmatprep.mubr.f32.mxu0 %v4442_v3 }
  0x45   :  { %556 = vmatprep.mubr.f32.mxu1 %v4442_v3 }
  0x47   :  { %2286 = vmatmul.mubr.msk.f32.gmra.mrb[26].mxu0 %vm79_vm1, %v2259_v62 }
  0x48   :  { %2295 = vmatmul.mubr.msk.f32.gmra.mrb[26].mxu1 %vm79_vm1, %v2259_v62  ;;  %735 = vmatprep.mubr.f32.mxu0 %v4442_v3 }
  0x49   :  { %842 = vmatprep.mubr.f32.mxu1 %v4442_v3 }
  0x4b   :  { %2298 = vmatmul.mubr.msk.f32.vlgmr.msra.gmra.mrb[28].mxu0 %vm79_vm1, %v49_v63 }
  0x4c   :  { %2307 = vmatmul.mubr.msk.f32.vlgmr.msra.gmra.mrb[28].mxu1 %vm79_vm1, %v49_v63  ;;  %741 = vmatprep.mubr.f32.mxu0 %v4442_v3 }
  0x4d   :  { %848 = vmatprep.mubr.f32.mxu1 %v4442_v3 }
  0x4f   :  { %2299 = vmatmul.mubr.msk.f32.gmra.mrb[30].mxu0 %vm79_vm1, %v50_v0 }
  0x50   :  { %2308 = vmatmul.mubr.msk.f32.gmra.mrb[30].mxu1 %vm79_vm1, %v50_v0  ;;  %747 = vmatprep.mubr.f32.mxu0 %v4442_v3 }
  0x51   :  { %854 = vmatprep.mubr.f32.mxu1 %v4442_v3 }
  0x53   :  { %2300 = vmatmul.mubr.msk.f32.gmra.mrb[32].mxu0 %vm79_vm1, %v51_v1 }
  0x54   :  { %2309 = vmatmul.mubr.msk.f32.gmra.mrb[32].mxu1 %vm79_vm1, %v51_v1  ;;  %753 = vmatprep.mubr.f32.mxu0 %v4442_v3 }
  0x55   :  { %860 = vmatprep.mubr.f32.mxu1 %v4442_v3 }
  0x57   :  { %2301 = vmatmul.mubr.msk.f32.gmra.mrb[34].mxu0 %vm79_vm1, %v52_v2 }
  0x58   :  { %2310 = vmatmul.mubr.msk.f32.gmra.mrb[34].mxu1 %vm79_vm1, %v52_v2  ;;  %759 = vmatprep.mubr.f32.mxu0 %v4442_v3 }
  0x59   :  { %866 = vmatprep.mubr.f32.mxu1 %v4442_v3 }
  0x5b   :  { %2302 = vmatmul.mubr.msk.f32.gmra.mrb[36].mxu0 %vm79_vm1, %v53_v4 }
  0x5c   :  { %2311 = vmatmul.mubr.msk.f32.gmra.mrb[36].mxu1 %vm79_vm1, %v53_v4  ;;  %765 = vmatprep.mubr.f32.mxu0 %v4442_v3 }
  0x5d   :  { %872 = vmatprep.mubr.f32.mxu1 %v4442_v3 }
  0x5f   :  { %2303 = vmatmul.mubr.msk.f32.gmra.mrb[38].mxu0 %vm79_vm1, %v54_v5 }
  0x60   :  { %2312 = vmatmul.mubr.msk.f32.gmra.mrb[38].mxu1 %vm79_vm1, %v54_v5  ;;  %771 = vmatprep.mubr.f32.mxu0 %v4442_v3 }
  0x61   :  { %878 = vmatprep.mubr.f32.mxu1 %v4442_v3 }
  0x63   :  { %2304 = vmatmul.mubr.msk.f32.gmra.mrb[40].mxu0 %vm79_vm1, %v55_v6 }
  0x64   :  { %2313 = vmatmul.mubr.msk.f32.gmra.mrb[40].mxu1 %vm79_vm1, %v55_v6  ;;  %1165 = vmatprep.mubr.f32.mxu0 %v4442_v3 }
  0x65   :  { %1272 = vmatprep.mubr.f32.mxu1 %v4442_v3 }
  0xe6   :  { %v180_v7 = vpop.f32.mrb[0].mxu0 }
  0xe7   :  { %v287_v8 = vpop.f32.mrb[0].mxu1  ;;  %v182_v9 = vpop.f32.mrb[1].mxu0 }
  0xe8   :  { %591 = vrot.lane.b32.xlu0 %v287_v8, %s2711_s26  ;;  %v289_v10 = vpop.f32.mrb[1].mxu1  ;;  %577 = vrot.lane.b32.xlu1 %v182_v9, %s2711_s26 }
  0xea   :  { %v186_v11 = vpop.f32.mrb[2].mxu0 }
  0xeb   :  { %v293_v12 = vpop.f32.mrb[2].mxu1  ;;  %v188_v13 = vpop.f32.mrb[3].mxu0 }
  0xec   :  { %v295_v14 = vpop.f32.mrb[3].mxu1  ;;  %563 = vrot.lane.b32.xlu0 %v180_v7, %s2711_s26  ;;  %593 = vrot.lane.b32.xlu1 %v293_v12, %s2711_s26 }
  0xee   :  { %v192_v15 = vpop.f32.mrb[4].mxu0 }
  0xef   :  { %v299_v16 = vpop.f32.mrb[4].mxu1  ;;  %v194_v17 = vpop.f32.mrb[5].mxu0 }
  0xf0   :  { %605 = vrot.lane.b32.xlu0 %v289_v10, %s2711_s26  ;;  %565 = vrot.lane.b32.xlu1 %v186_v11, %s2711_s26  ;;  %v301_v18 = vpop.f32.mrb[5].mxu1 }
  0xf2   :  { %v198_v19 = vpop.f32.mrb[6].mxu0 }
  0xf3   :  { %v305_v20 = vpop.f32.mrb[6].mxu1  ;;  %v200_v21 = vpop.f32.mrb[7].mxu0 }
  0xf4   :  { %595 = vrot.lane.b32.xlu0 %v299_v16, %s2711_s26  ;;  %579 = vrot.lane.b32.xlu1 %v188_v13, %s2711_s26  ;;  %v307_v22 = vpop.f32.mrb[7].mxu1 }
  0xf6   :  { %v204_v23 = vpop.f32.mrb[8].mxu0 }
  0xf7   :  { %v311_v24 = vpop.f32.mrb[8].mxu1  ;;  %v206_v25 = vpop.f32.mrb[9].mxu0 }
  0xf8   :  { %567 = vrot.lane.b32.xlu0 %v192_v15, %s2711_s26  ;;  %607 = vrot.lane.b32.xlu1 %v295_v14, %s2711_s26  ;;  %v313_v26 = vpop.f32.mrb[9].mxu1 }
  0xfa   :  { %v210_v27 = vpop.f32.mrb[10].mxu0 }
  0xfb   :  { %v317_v28 = vpop.f32.mrb[10].mxu1  ;;  %v212_v29 = vpop.f32.mrb[11].mxu0 }
  0xfc   :  { %581 = vrot.lane.b32.xlu0 %v194_v17, %s2711_s26  ;;  %597 = vrot.lane.b32.xlu1 %v305_v20, %s2711_s26  ;;  %v319_v30 = vpop.f32.mrb[11].mxu1 }
  0xfe   :  { %v216_v31 = vpop.f32.mrb[12].mxu0 }
  0xff   :  { %v323_v32 = vpop.f32.mrb[12].mxu1  ;;  %v218_v33 = vpop.f32.mrb[13].mxu0 }
 0x100   :  { %609 = vrot.lane.b32.xlu0 %v301_v18, %s2711_s26  ;;  %569 = vrot.lane.b32.xlu1 %v198_v19, %s2711_s26  ;;  %v325_v34 = vpop.f32.mrb[13].mxu1 }
 0x102   :  { %v415_v35 = vpop.f32.mrb[14].mxu0 }
 0x103   :  { %v522_v36 = vpop.f32.mrb[14].mxu1  ;;  %v417_v37 = vpop.f32.mrb[15].mxu0 }
 0x104   :  { %599 = vrot.lane.b32.xlu0 %v311_v24, %s2711_s26  ;;  %583 = vrot.lane.b32.xlu1 %v200_v21, %s2711_s26  ;;  %v524_v38 = vpop.f32.mrb[15].mxu1 }
 0x106   :  { %v421_v39 = vpop.f32.mrb[16].mxu0 }
 0x107   :  { %v528_v40 = vpop.f32.mrb[16].mxu1  ;;  %v423_v41 = vpop.f32.mrb[17].mxu0 }
 0x108   :  { %571 = vrot.lane.b32.xlu0 %v204_v23, %s2711_s26  ;;  %611 = vrot.lane.b32.xlu1 %v307_v22, %s2711_s26  ;;  %v530_v42 = vpop.f32.mrb[17].mxu1 }
 0x10a   :  { %v427_v43 = vpop.f32.mrb[18].mxu0 }
 0x10b   :  { %v534_v44 = vpop.f32.mrb[18].mxu1  ;;  %v429_v45 = vpop.f32.mrb[19].mxu0 }
 0x10c   :  { %585 = vrot.lane.b32.xlu0 %v206_v25, %s2711_s26  ;;  %601 = vrot.lane.b32.xlu1 %v317_v28, %s2711_s26  ;;  %v3109_v46 = vpop.f32.mrb[19].mxu1  ;;  %v3216_v28 = vpop.permute.xlu0 %1000 }
 0x10e   :  { %v3111_v47 = vpop.f32.mrb[20].mxu0 }
 0x10f   :  { %v540_v48 = vpop.f32.mrb[20].mxu1  ;;  %v3113_v49 = vpop.f32.mrb[21].mxu0 }
 0x110   :  { %613 = vrot.lane.b32.xlu0 %v313_v26, %s2711_s26  ;;  %573 = vrot.lane.b32.xlu1 %v210_v27, %s2711_s26  ;;  %v3117_v50 = vpop.f32.mrb[21].mxu1 }
 0x112   :  { %v3119_v51 = vpop.f32.mrb[22].mxu0 }
 0x113   :  { %v546_v52 = vpop.f32.mrb[22].mxu1  ;;  %v3121_v53 = vpop.f32.mrb[23].mxu0 }
 0x114   :  { %603 = vrot.lane.b32.xlu0 %v323_v32, %s2711_s26  ;;  %587 = vrot.lane.b32.xlu1 %v212_v29, %s2711_s26  ;;  %v3125_v54 = vpop.f32.mrb[23].mxu1  ;;  %v3222_v29 = vpop.permute.xlu0 %1005 }
 0x115   :  { %v3238_v32 = vpop.permute.xlu1 %1015 }
 0x116   :  { %v3127_v55 = vpop.f32.mrb[24].mxu0 }
 0x117   :  { %v552_v56 = vpop.f32.mrb[24].mxu1  ;;  %v3129_v57 = vpop.f32.mrb[25].mxu0 }
 0x118   :  { %617 = vrot.lane.b32.xlu0 %v325_v34, %s2711_s26  ;;  %615 = vrot.lane.b32.xlu1 %v319_v30, %s2711_s26  ;;  %v3133_v58 = vpop.f32.mrb[25].mxu1  ;;  %v3231_v30 = vpop.permute.xlu0 %1010 }
 0x119   :  { %v3247_v34 = vpop.permute.xlu1 %1025 }
 0x11a   :  { %v3135_v59 = vpop.f32.mrb[26].mxu0  ;;  %4466 = vst [vmem:[#allocation11_spill] sm:$0xff] %v3247_v34 }
 0x11b   :  { %v558_v60 = vpop.f32.mrb[26].mxu1  ;;  %v3137_v61 = vpop.f32.mrb[27].mxu0 }
 0x11c   :  { %913 = vrot.lane.b32.xlu0 %v522_v36, %s2712_s27  ;;  %575 = vrot.lane.b32.xlu1 %v216_v31, %s2711_s26  ;;  %v560_v62 = vpop.f32.mrb[27].mxu1  ;;  %v3236_v31 = vpop.permute.xlu0 %1020 }
 0x11d   :  { %4464 = vst [vmem:[#allocation9_spill] sm:$0xff] %v3236_v31 }
 0x11e   :  { %v3141_v63 = vpop.f32.mrb[28].mxu0 }
 0x11f   :  { %v3143_v0 = vpop.f32.mrb[29].mxu0  ;;  %v3145_v1 = vpop.f32.mrb[28].mxu1 }
 0x120   :  { %885 = vrot.lane.b32.xlu0 %v415_v35, %s2712_s27  ;;  %589 = vrot.lane.b32.xlu1 %v218_v33, %s2711_s26  ;;  %v3149_v2 = vpop.f32.mrb[29].mxu1  ;;  %v3245_v33 = vpop.permute.xlu0 %1030 }
 0x121   :  { %4465 = vst [vmem:[#allocation10_spill] sm:$0xff] %v3245_v33 }
 0x122   :  { %v3151_v4 = vpop.f32.mrb[30].mxu0 }
 0x123   :  { %v3153_v5 = vpop.f32.mrb[31].mxu0  ;;  %v3155_v6 = vpop.f32.mrb[30].mxu1 }
 0x124   :  { %899 = vrot.lane.b32.xlu0 %v417_v37, %s2712_s27  ;;  %915 = vrot.lane.b32.xlu1 %v528_v40, %s2712_s27  ;;  %v3159_v7 = vpop.f32.mrb[31].mxu1 }
 0x126   :  { %v3161_v8 = vpop.f32.mrb[32].mxu0 }
 0x127   :  { %v3163_v9 = vpop.f32.mrb[33].mxu0  ;;  %v3165_v10 = vpop.f32.mrb[32].mxu1 }
 0x128   :  { %927 = vrot.lane.b32.xlu0 %v524_v38, %s2712_s27  ;;  %887 = vrot.lane.b32.xlu1 %v421_v39, %s2712_s27  ;;  %v3169_v11 = vpop.f32.mrb[33].mxu1 }
 0x12a   :  { %v3171_v12 = vpop.f32.mrb[34].mxu0 }
 0x12b   :  { %v3173_v13 = vpop.f32.mrb[35].mxu0  ;;  %v3175_v14 = vpop.f32.mrb[34].mxu1 }
 0x12c   :  { %917 = vrot.lane.b32.xlu0 %v534_v44, %s2712_s27  ;;  %901 = vrot.lane.b32.xlu1 %v423_v41, %s2712_s27  ;;  %v3179_v15 = vpop.f32.mrb[35].mxu1 }
 0x12e   :  { %v3181_v16 = vpop.f32.mrb[36].mxu0 }
 0x12f   :  { %v3183_v17 = vpop.f32.mrb[37].mxu0  ;;  %v3185_v18 = vpop.f32.mrb[36].mxu1 }
 0x130   :  { %889 = vrot.lane.b32.xlu0 %v427_v43, %s2712_s27  ;;  %929 = vrot.lane.b32.xlu1 %v530_v42, %s2712_s27  ;;  %v3189_v19 = vpop.f32.mrb[37].mxu1 }
 0x132   :  { %v3191_v20 = vpop.f32.mrb[38].mxu0 }
 0x133   :  { %v3193_v21 = vpop.f32.mrb[39].mxu0  ;;  %v3195_v22 = vpop.f32.mrb[38].mxu1 }
 0x134   :  { %4458 = vst [vmem:[#allocation3_spill] sm:$0xff] %v3193_v21  ;;  %903 = vrot.lane.b32.xlu0 %v429_v45, %s2712_s27  ;;  %919 = vrot.lane.b32.xlu1 %v540_v48, %s2712_s27  ;;  %v3199_v23 = vpop.f32.mrb[39].mxu1 }
 0x135   :  { %4459 = vst [vmem:[#allocation4_spill] sm:$0xff] %v3199_v23 }
 0x136   :  { %v3201_v24 = vpop.f32.mrb[40].mxu0 }
 0x137   :  { %4460 = vst [vmem:[#allocation5_spill] sm:$0xff] %v3201_v24  ;;  %v3203_v25 = vpop.f32.mrb[40].mxu1  ;;  %v3205_v26 = vpop.f32.mrb[41].mxu0 }
 0x138   :  { %4461 = vst [vmem:[#allocation6_spill] sm:$0xff] %v3203_v25  ;;  %4462 = vst [vmem:[#allocation7_spill] sm:$0xff] %v3205_v26  ;;  %931 = vrot.lane.b32.xlu0 %v3109_v46, %s2712_s27  ;;  %891 = vrot.lane.b32.xlu1 %v3111_v47, %s2712_s27  ;;  %v3211_v27 = vpop.f32.mrb[41].mxu1 }
 0x139   :  { %4463 = vst [vmem:[#allocation8_spill] sm:$0xff] %v3211_v27 }
 0x13c   :  { %921 = vrot.lane.b32.xlu0 %v546_v52, %s2712_s27  ;;  %905 = vrot.lane.b32.xlu1 %v3113_v49, %s2712_s27 }
 0x140   :  { %893 = vrot.lane.b32.xlu0 %v3119_v51, %s2712_s27  ;;  %933 = vrot.lane.b32.xlu1 %v3117_v50, %s2712_s27  ;;  %v619_v51 = vlaneseq }
 0x144   :  { %907 = vrot.lane.b32.xlu0 %v3121_v53, %s2712_s27  ;;  %923 = vrot.lane.b32.xlu1 %v552_v56, %s2712_s27 }
 0x148   :  { %935 = vrot.lane.b32.xlu0 %v3125_v54, %s2712_s27  ;;  %895 = vrot.lane.b32.xlu1 %v3127_v55, %s2712_s27  ;;  %v3271_v54 = vand.u32 127, %v619_v51 }
 0x14a   :  { %vm621_vm2 = vcmp.lt.s32.totalorder %v3271_v54, 127  ;;  %vm941_vm3 = vcmp.lt.s32.totalorder %v3271_v54, 126 }
 0x14c   :  { %925 = vrot.lane.b32.xlu0 %v558_v60, %s2712_s27  ;;  %909 = vrot.lane.b32.xlu1 %v3129_v57, %s2712_s27 }
 0x150   :  { %939 = vrot.lane.b32.xlu0 %v560_v62, %s2712_s27  ;;  %937 = vrot.lane.b32.xlu1 %v3133_v58, %s2712_s27 }
 0x154   :  { %911 = vrot.lane.b32.xlu1 %v3137_v61, %s2712_s27 }
 0x158   :  { %897 = vrot.lane.b32.xlu1 %v3135_v59, %s2712_s27 }
 0x15a   :  { %v592_v35 = vpop.permute.xlu0 %591  ;;  %v578_v36 = vpop.permute.xlu1 %577 }
 0x15b   :  { %v629_v25 = vsel %vm621_vm2, %v578_v36, %v592_v35 }
 0x15e   :  { %v564_v37 = vpop.permute.xlu0 %563  ;;  %v594_v38 = vpop.permute.xlu1 %593 }
 0x15f   :  { %v636_v34 = vsel %vm621_vm2, %v564_v37, %v578_v36 }
 0x162   :  { %v606_v39 = vpop.permute.xlu0 %605  ;;  %v566_v40 = vpop.permute.xlu1 %565 }
 0x166   :  { %v3251_v41 = vpop.permute.xlu0 %595  ;;  %v580_v42 = vpop.permute.xlu1 %579 }
 0x167   :  { %v637_v36 = vsel %vm621_vm2, %v566_v40, %v580_v42 }
 0x16a   :  { %v3253_v43 = vpop.permute.xlu0 %567  ;;  %v608_v44 = vpop.permute.xlu1 %607 }
 0x16e   :  { %v3255_v45 = vpop.permute.xlu0 %581  ;;  %v3257_v46 = vpop.permute.xlu1 %597 }
 0x172   :  { %v3259_v47 = vpop.permute.xlu0 %609  ;;  %v3261_v48 = vpop.permute.xlu1 %569 }
 0x176   :  { %v3263_v49 = vpop.permute.xlu0 %599  ;;  %v3265_v50 = vpop.permute.xlu1 %583 }
 0x17a   :  { %v3267_v52 = vpop.permute.xlu0 %571  ;;  %v3269_v53 = vpop.permute.xlu1 %611 }
 0x17e   :  { %v3273_v55 = vpop.permute.xlu0 %585  ;;  %v3275_v56 = vpop.permute.xlu1 %601 }
 0x182   :  { %v3278_v57 = vpop.permute.xlu0 %613  ;;  %v3280_v58 = vpop.permute.xlu1 %573 }
 0x183   :  { %v626_v59 = vsel %vm621_vm2, %v3263_v49, %v3278_v57 }
 0x184   :  { %v3287_v60 = vadd.f32 %v3185_v18, %v626_v59 }
 0x186   :  { %4467 = vst [vmem:[#allocation12_spill] sm:$0xff] %v3287_v60  ;;  %v3289_v61 = vpop.permute.xlu0 %603  ;;  %v3291_v62 = vpop.permute.xlu1 %587  ;;  %v630_v60 = vsel %vm621_vm2, %v580_v42, %v594_v38 }
 0x187   :  { %4468 = vst [vmem:[#allocation13_spill] sm:$0xff] %v3289_v61 }
 0x18a   :  { %v3293_v51 = vpop.permute.xlu0 %617  ;;  %v3295_v3 = vpop.permute.xlu1 %615 }
 0x18b   :  { %4469 = vst [vmem:[#allocation14_spill] sm:$0xff] %v3293_v51  ;;  %4470 = vst [vmem:[#allocation15_spill] sm:$0xff] %v3295_v3  ;;  %v627_v33 = vsel %vm621_vm2, %v3275_v56, %v3295_v3  ;;  %v643_v51 = vsel %vm621_vm2, %v606_v39, %v564_v37  ;;  %v746_v37 = vadd.f32 %v3153_v5, %v630_v60 }
 0x18c   :  { %v3302_v24 = vadd.f32 %v3195_v22, %v627_v33 }
 0x18e   :  { %4471 = vst [vmem:[#allocation16_spill] sm:$0xff] %v3302_v24  ;;  %v914_v27 = vpop.permute.xlu0 %913  ;;  %v3304_v26 = vpop.permute.xlu1 %575  ;;  %v738_v24 = vadd.f32 %v3141_v63, %v636_v34  ;;  %v847_v34 = vadd.f32 %v3149_v2, %v643_v51 }
 0x18f   :  { %4472 = vst [vmem:[#allocation17_spill] sm:$0xff] %v3304_v26  ;;  %v740_v26 = vadd.f32 %v3143_v0, %v629_v25 }
 0x192   :  { %v886_v18 = vpop.permute.xlu0 %885  ;;  %v3306_v59 = vpop.permute.xlu1 %589 }
 0x193   :  { %4473 = vst [vmem:[#allocation18_spill] sm:$0xff] %v3306_v59  ;;  %v622_v59 = vsel %vm621_vm2, %v592_v35, %v606_v39  ;;  %v744_v35 = vadd.f32 %v3151_v4, %v637_v36 }
 0x194   :  { %v845_v25 = vadd.f32 %v3145_v1, %v622_v59 }
 0x196   :  { %v900_v23 = vpop.permute.xlu0 %899  ;;  %v916_v61 = vpop.permute.xlu1 %915 }
 0x197   :  { %v949_v22 = vsel %vm941_vm3, %v900_v23, %v914_v27  ;;  %v956_v33 = vsel %vm941_vm3, %v886_v18, %v900_v23 }
 0x198   :  { %v970_v31 = vadd.f32 %v956_v33, %v738_v24  ;;  %v971_v3 = vadd.f32 %v949_v22, %v740_v26  ;;  %v623_v24 = vsel %vm621_vm2, %v594_v38, %v608_v44  ;;  %v644_v26 = vsel %vm621_vm2, %v608_v44, %v566_v40 }
 0x199   :  { %v851_v38 = vadd.f32 %v3155_v6, %v623_v24  ;;  %v853_v40 = vadd.f32 %v3159_v7, %v644_v26 }
 0x19a   :  { %v928_v21 = vpop.permute.xlu0 %927  ;;  %v888_v23 = vpop.permute.xlu1 %887  ;;  %v1033_v39 = vadd.f32 %v3216_v28, %v970_v31  ;;  %v631_v31 = vsel %vm621_vm2, %v3255_v45, %v3251_v41 }
 0x19b   :  { %v942_v0 = vsel %vm941_vm3, %v914_v27, %v928_v21  ;;  %v963_v63 = vsel %vm941_vm3, %v928_v21, %v886_v18  ;;  %v1034_v27 = vadd.f32 %v3216_v28, %v971_v3  ;;  %v638_v3 = vsel %vm621_vm2, %v3253_v43, %v3255_v45 }
 0x19c   :  { %v972_v18 = vadd.f32 %v942_v0, %v845_v25  ;;  %v973_v1 = vadd.f32 %v963_v63, %v847_v34  ;;  %v1061_v44 = vmax.f32 %v1033_v39, 0.0 }
 0x19d   :  { %v1062_v51 = vmax.f32 %v1034_v27, 0.0 }
 0x19e   :  { %v918_v42 = vpop.permute.xlu0 %917  ;;  %v902_v21 = vpop.permute.xlu1 %901  ;;  %v1035_v7 = vadd.f32 %v3216_v28, %v972_v18  ;;  %v1036_v36 = vadd.f32 %v3216_v28, %v973_v1  ;;  %v750_v18 = vadd.f32 %v3161_v8, %v638_v3  ;;  %v645_v8 = vsel %vm621_vm2, %v3259_v47, %v3253_v43 }
 0x19f   :  { %v950_v2 = vsel %vm941_vm3, %v902_v21, %v916_v61  ;;  %v957_v4 = vsel %vm941_vm3, %v888_v23, %v902_v21 }
 0x1a0   :  { %v974_v5 = vadd.f32 %v957_v4, %v744_v35  ;;  %v975_v60 = vadd.f32 %v950_v2, %v746_v37  ;;  %v1063_v2 = vmax.f32 %v1035_v7, 0.0  ;;  %v1064_v4 = vmax.f32 %v1036_v36, 0.0 }
 0x1a2   :  { %v1037_v59 = vadd.f32 %v3222_v29, %v974_v5  ;;  %v1038_v22 = vadd.f32 %v3222_v29, %v975_v60  ;;  %v890_v33 = vpop.permute.xlu0 %889  ;;  %v930_v6 = vpop.permute.xlu1 %929 }
 0x1a3   :  { %v943_v0 = vsel %vm941_vm3, %v916_v61, %v930_v6  ;;  %v964_v63 = vsel %vm941_vm3, %v930_v6, %v888_v23  ;;  %v752_v61 = vadd.f32 %v3163_v9, %v631_v31  ;;  %v639_v9 = vsel %vm621_vm2, %v3261_v48, %v3265_v50 }
 0x1a4   :  { %v1065_v25 = vmax.f32 %v1037_v59, 0.0  ;;  %v1066_v45 = vmax.f32 %v1038_v22, 0.0  ;;  %v976_v34 = vadd.f32 %v943_v0, %v851_v38  ;;  %v977_v35 = vadd.f32 %v964_v63, %v853_v40 }
 0x1a5   :  { %v624_v38 = vsel %vm621_vm2, %v3251_v41, %v3259_v47  ;;  %v632_v40 = vsel %vm621_vm2, %v3265_v50, %v3257_v46  ;;  %v859_v22 = vadd.f32 %v3169_v11, %v645_v8  ;;  %v756_v6 = vadd.f32 %v3171_v12, %v639_v9 }
 0x1a6   :  { %v3363_v37 = vpack.c.bf16 %v1065_v25, %v1061_v44  ;;  %v1039_v24 = vadd.f32 %v3222_v29, %v976_v34  ;;  %v1040_v26 = vadd.f32 %v3222_v29, %v977_v35  ;;  %v904_v39 = vpop.permute.xlu0 %903  ;;  %v920_v27 = vpop.permute.xlu1 %919  ;;  %v3367_v21 = vpack.c.bf16 %v1066_v45, %v1062_v51 }
 0x1a7   :  { %v951_v23 = vsel %vm941_vm3, %v904_v39, %v918_v42  ;;  %v958_v1 = vsel %vm941_vm3, %v890_v33, %v904_v39  ;;  %v857_v50 = vadd.f32 %v3165_v10, %v624_v38  ;;  %v758_v7 = vadd.f32 %v3173_v13, %v632_v40 }
 0x1a8   :  { %v1067_v5 = vmax.f32 %v1039_v24, 0.0  ;;  %v1068_v60 = vmax.f32 %v1040_v26, 0.0  ;;  %2547 = vmatprep.subr.bf16.mxu0 %v3367_v21  ;;  %v978_v41 = vadd.f32 %v958_v1, %v750_v18  ;;  %v979_v31 = vadd.f32 %v951_v23, %v752_v61 }
 0x1a9   :  { %2549 = vmatpush1.bf16.msra.mxu0 %v3363_v37  ;;  %v633_v38 = vsel %vm621_vm2, %v3273_v55, %v3263_v49 }
 0x1aa   :  { %v3393_v3 = vpack.c.bf16 %v1067_v5, %v1063_v2  ;;  %v932_v44 = vpop.permute.xlu0 %931  ;;  %v892_v51 = vpop.permute.xlu1 %891  ;;  %v3395_v59 = vpack.c.bf16 %v1068_v60, %v1064_v4  ;;  %v1041_v10 = vadd.f32 %v3231_v30, %v978_v41  ;;  %v1042_v11 = vadd.f32 %v3231_v30, %v979_v31 }
 0x1ab   :  { %v944_v43 = vsel %vm941_vm3, %v918_v42, %v932_v44  ;;  %v965_v47 = vsel %vm941_vm3, %v932_v44, %v890_v33  ;;  %v625_v42 = vsel %vm621_vm2, %v3257_v46, %v3269_v53  ;;  %v646_v33 = vsel %vm621_vm2, %v3269_v53, %v3261_v48 }
 0x1ac   :  { %2559 = vmatprep.subr.bf16.mxu1 %v3395_v59  ;;  %v980_v0 = vadd.f32 %v944_v43, %v857_v50  ;;  %v981_v13 = vadd.f32 %v965_v47, %v859_v22  ;;  %v863_v34 = vadd.f32 %v3175_v14, %v625_v42  ;;  %v865_v48 = vadd.f32 %v3179_v15, %v646_v33 }
 0x1ad   :  { %2561 = vmatpush1.bf16.msra.mxu1 %v3393_v3  ;;  %v1069_v53 = vmax.f32 %v1041_v10, 0.0  ;;  %v1070_v35 = vmax.f32 %v1042_v11, 0.0  ;;  %v640_v60 = vsel %vm621_vm2, %v3267_v52, %v3273_v55  ;;  %v764_v22 = vadd.f32 %v3183_v17, %v633_v38 }
 0x1ae   :  { %v922_v36 = vpop.permute.xlu0 %921  ;;  %v906_v12 = vpop.permute.xlu1 %905  ;;  %v1043_v61 = vadd.f32 %v3231_v30, %v980_v0  ;;  %v1044_v23 = vadd.f32 %v3231_v30, %v981_v13  ;;  %v762_v55 = vadd.f32 %v3181_v16, %v640_v60  ;;  %v641_v16 = vsel %vm621_vm2, %v3280_v58, %v3291_v62  ;;  %v4474_v13 = vld [vmem:[#allocation3_spill] sm:$0xff] }
 0x1af   :  { %v952_v63 = vsel %vm941_vm3, %v906_v12, %v920_v27  ;;  %v959_v25 = vsel %vm941_vm3, %v892_v51, %v906_v12  ;;  %v634_v17 = vsel %vm621_vm2, %v3291_v62, %v3275_v56  ;;  %v768_v0 = vadd.f32 %v3191_v20, %v641_v16 }
 0x1b0   :  { %v982_v46 = vadd.f32 %v959_v25, %v756_v6  ;;  %v983_v45 = vadd.f32 %v952_v63, %v758_v7  ;;  %v1071_v44 = vmax.f32 %v1043_v61, 0.0  ;;  %v647_v6 = vsel %vm621_vm2, %v3278_v57, %v3267_v52  ;;  %v4475_v25 = vld [vmem:[#allocation15_spill] sm:$0xff] }
 0x1b1   :  { %v871_v52 = vadd.f32 %v3189_v19, %v647_v6  ;;  %v770_v63 = vadd.f32 %v4474_v13, %v634_v17  ;;  %v648_v56 = vsel %vm621_vm2, %v4475_v25, %v3280_v58  ;;  %v4476_v19 = vld [vmem:[#allocation9_spill] sm:$0xff]  ;;  %v4478_v58 = vld [vmem:[#allocation14_spill] sm:$0xff]  ;;  %v4485_v6 = vld [vmem:[#allocation7_spill] sm:$0xff] }
 0x1b2   :  { %v1045_v24 = vadd.f32 %v3238_v32, %v982_v46  ;;  %v1046_v26 = vadd.f32 %v3238_v32, %v983_v45  ;;  %v894_v39 = vpop.permute.xlu0 %893  ;;  %v934_v18 = vpop.permute.xlu1 %933 }
 0x1b3   :  { %v945_v1 = vsel %vm941_vm3, %v920_v27, %v934_v18  ;;  %v966_v14 = vsel %vm941_vm3, %v934_v18, %v892_v51  ;;  %v1072_v51 = vmax.f32 %v1044_v23, 0.0  ;;  %v4479_v18 = vld [vmem:[#allocation13_spill] sm:$0xff]  ;;  %v4480_v23 = vld [vmem:[#allocation4_spill] sm:$0xff] }
 0x1b4   :  { %v1073_v2 = vmax.f32 %v1045_v24, 0.0  ;;  %v1074_v15 = vmax.f32 %v1046_v26, 0.0  ;;  %v984_v4 = vadd.f32 %v945_v1, %v863_v34  ;;  %v985_v5 = vadd.f32 %v966_v14, %v865_v48  ;;  %v4481_v14 = vld [vmem:[#allocation18_spill] sm:$0xff] }
 0x1b5   :  { %v877_v1 = vadd.f32 %v4480_v23, %v648_v56 }
 0x1b6   :  { %v3439_v8 = vpack.c.bf16 %v1073_v2, %v1069_v53  ;;  %v1047_v27 = vadd.f32 %v3238_v32, %v984_v4  ;;  %v1048_v9 = vadd.f32 %v3238_v32, %v985_v5  ;;  %v908_v40 = vpop.permute.xlu0 %907  ;;  %v924_v41 = vpop.permute.xlu1 %923  ;;  %v3443_v31 = vpack.c.bf16 %v1074_v15, %v1070_v35  ;;  %v4477_v53 = vld [vmem:[#allocation12_spill] sm:$0xff]  ;;  %v4482_v15 = vld [vmem:[#allocation11_spill] sm:$0xff] }
 0x1b7   :  { %v953_v50 = vsel %vm941_vm3, %v908_v40, %v922_v36  ;;  %v960_v49 = vsel %vm941_vm3, %v894_v39, %v908_v40  ;;  %v635_v2 = vsel %vm621_vm2, %v4481_v14, %v4479_v18 }
 0x1b8   :  { %v1075_v43 = vmax.f32 %v1047_v27, 0.0  ;;  %v1076_v47 = vmax.f32 %v1048_v9, 0.0  ;;  %2551 = vmatprep.subr.bf16.mxu0 %v3443_v31  ;;  %v986_v11 = vadd.f32 %v960_v49, %v762_v55  ;;  %v987_v12 = vadd.f32 %v953_v50, %v764_v22  ;;  %v4483_v50 = vld [vmem:[#allocation16_spill] sm:$0xff]  ;;  %v4484_v55 = vld [vmem:[#allocation6_spill] sm:$0xff] }
 0x1b9   :  { %2553 = vmatpush1.bf16.msra.mxu0 %v3439_v8 }
 0x1ba   :  { %v3457_v7 = vpack.c.bf16 %v1075_v43, %v1071_v44  ;;  %v936_v42 = vpop.permute.xlu0 %935  ;;  %v896_v33 = vpop.permute.xlu1 %895  ;;  %v3459_v10 = vpack.c.bf16 %v1076_v47, %v1072_v51  ;;  %v1049_v34 = vadd.f32 %v4476_v19, %v986_v11 }
 0x1bb   :  { %v946_v57 = vsel %vm941_vm3, %v922_v36, %v936_v42  ;;  %v967_v62 = vsel %vm941_vm3, %v936_v42, %v894_v39  ;;  %v1050_v36 = vadd.f32 %v4476_v19, %v987_v12  ;;  %v628_v39 = vsel %vm621_vm2, %v4479_v18, %v4478_v58 }
 0x1bc   :  { %2563 = vmatprep.subr.bf16.mxu1 %v3459_v10  ;;  %v988_v35 = vadd.f32 %v946_v57, %v4477_v53  ;;  %v989_v61 = vadd.f32 %v967_v62, %v871_v52  ;;  %v1077_v38 = vmax.f32 %v1049_v34, 0.0  ;;  %v881_v22 = vadd.f32 %v4484_v55, %v628_v39  ;;  %v4486_v57 = vld [vmem:[#allocation17_spill] sm:$0xff]  ;;  %v2696_v55 = vld [vmem:[%s4437_s1 + $0x78] sm:$0xff] }
 0x1bd   :  { %2565 = vmatpush1.bf16.msra.mxu1 %v3457_v7  ;;  %v1078_v27 = vmax.f32 %v1050_v36, 0.0  ;;  %v776_v42 = vadd.f32 %v4485_v6, %v635_v2  ;;  %v642_v13 = vsel %vm621_vm2, %v4486_v57, %v4481_v14  ;;  %v2704_v6 = vld [vmem:[%s4437_s1 + $0x10] sm:$0xff] }
 0x1be   :  { %v926_v46 = vpop.permute.xlu0 %925  ;;  %v910_v45 = vpop.permute.xlu1 %909  ;;  %v1051_v51 = vadd.f32 %v4476_v19, %v988_v35  ;;  %v1052_v16 = vadd.f32 %v4476_v19, %v989_v61  ;;  %v4488_v35 = vld [vmem:[#allocation5_spill] sm:$0xff] }
 0x1bf   :  { %v954_v48 = vsel %vm941_vm3, %v910_v45, %v924_v41  ;;  %v961_v20 = vsel %vm941_vm3, %v896_v33, %v910_v45 }
 0x1c0   :  { %v990_v24 = vadd.f32 %v961_v20, %v768_v0  ;;  %v991_v26 = vadd.f32 %v954_v48, %v770_v63  ;;  %v649_v0 = vsel %vm621_vm2, %v4478_v58, %v4486_v57  ;;  %v1079_v56 = vmax.f32 %v1051_v51, 0.0  ;;  %v4487_v20 = vld [vmem:[#allocation8_spill] sm:$0xff]  ;;  %v4489_v58 = vld [vmem:[#allocation10_spill] sm:$0xff]  ;;  %v2689_v51 = vld [vmem:[%s4437_s1 + $0x40] sm:$0xff] }
 0x1c1   :  { %v1080_v34 = vmax.f32 %v1052_v16, 0.0  ;;  %v883_v53 = vadd.f32 %v4487_v20, %v649_v0  ;;  %v2706_v16 = vld [vmem:[%s4437_s1 + $0x20] sm:$0xff] }
 0x1c2   :  { %v1053_v4 = vadd.f32 %v4482_v15, %v990_v24  ;;  %v1054_v5 = vadd.f32 %v4482_v15, %v991_v26  ;;  %v938_v60 = vpop.permute.xlu1 %937  ;;  %v940_v9 = vpop.permute.xlu0 %939  ;;  %v774_v24 = vadd.f32 %v4488_v35, %v642_v13 }
 0x1c3   :  { %v947_v40 = vsel %vm941_vm3, %v924_v41, %v938_v60  ;;  %v968_v44 = vsel %vm941_vm3, %v938_v60, %v896_v33  ;;  %v948_v41 = vsel %vm941_vm3, %v926_v46, %v940_v9 }
 0x1c4   :  { %v1081_v43 = vmax.f32 %v1053_v4, 0.0  ;;  %v1082_v47 = vmax.f32 %v1054_v5, 0.0  ;;  %v992_v49 = vadd.f32 %v947_v40, %v4483_v50  ;;  %v993_v17 = vadd.f32 %v968_v44, %v877_v1  ;;  %v2688_v40 = vld [vmem:[%s4437_s1 + $0x38] sm:$0xff] }
 0x1c5   :  { %v996_v36 = vadd.f32 %v948_v41, %v881_v22  ;;  %v4490_v44 = vmov 0.0   ;;  %v2692_v50 = vld [vmem:[%s4437_s1 + $0x58] sm:$0xff]  ;;  %v2703_v22 = vld [vmem:[%s4437_s1 + $0x8] sm:$0xff] }
 0x1c6   :  { %v3509_v11 = vpack.c.bf16 %v1081_v43, %v1077_v38  ;;  %v1055_v33 = vadd.f32 %v4482_v15, %v992_v49  ;;  %v912_v12 = vpop.permute.xlu1 %911  ;;  %v3514_v52 = vpack.c.bf16 %v1082_v47, %v1078_v27  ;;  %v1056_v63 = vadd.f32 %v4482_v15, %v993_v17  ;;  %v2690_v43 = vld [vmem:[%s4437_s1 + $0x48] sm:$0xff]  ;;  %v2691_v47 = vld [vmem:[%s4437_s1 + $0x50] sm:$0xff] }
 0x1c7   :  { %v955_v25 = vsel %vm941_vm3, %v912_v12, %v926_v46  ;;  %v1059_v4 = vadd.f32 %v4489_v58, %v996_v36  ;;  %v2695_v49 = vld [vmem:[%s4437_s1 + $0x70] sm:$0xff]  ;;  %v2707_v17 = vld [vmem:[%s4437_s1 + $0x28] sm:$0xff] }
 0x1c8   :  { %v1083_v62 = vmax.f32 %v1055_v33, 0.0  ;;  %v995_v45 = vadd.f32 %v955_v25, %v776_v42  ;;  %2555 = vmatprep.subr.bf16.mxu0 %v3514_v52  ;;  %v1084_v48 = vmax.f32 %v1056_v63, 0.0  ;;  %v2705_v42 = vld [vmem:[%s4437_s1 + $0x18] sm:$0xff] }
 0x1c9   :  { %2557 = vmatpush1.bf16.msra.mxu0 %v3509_v11 }
 0x1ca   :  { %v3531_v26 = vpack.c.bf16 %v1083_v62, %v1079_v56  ;;  %v1058_v18 = vadd.f32 %v4489_v58, %v995_v45  ;;  %v898_v39 = vpop.permute.xlu1 %897  ;;  %v3538_v23 = vpack.c.bf16 %v1084_v48, %v1080_v34 }
 0x1cb   :  { %v962_v46 = vsel %vm941_vm3, %v898_v39, %v912_v12  ;;  %v969_v61 = vsel %vm941_vm3, %v940_v9, %v898_v39  ;;  %v3553_v9 = vmax.f32 %v1059_v4, 0.0  ;;  %v1983_v39 = vld [vmem:[%s4439_s3 + $0x80] sm:$0xff] }
 0x1cc   :  { %v3540_v1 = vmax.f32 %v1058_v18, 0.0  ;;  %v994_v14 = vadd.f32 %v962_v46, %v774_v24  ;;  %v997_v2 = vadd.f32 %v969_v61, %v883_v53  ;;  %2567 = vmatprep.subr.bf16.mxu1 %v3538_v23  ;;  %v1984_v46 = vld [vmem:[%s4439_s3 + $0x88] sm:$0xff]  ;;  %v1967_v61 = vld [vmem:[%s4439_s3] sm:$0xff] }
 0x1cd   :  { %2569 = vmatpush1.bf16.msra.mxu1 %v3531_v26  ;;  %v2015_v4 = vld [vmem:[%s4439_s3 + $0x180] sm:$0xff] }
 0x1ce   :  { %v1057_v5 = vadd.f32 %v4489_v58, %v994_v14  ;;  %v1060_v60 = vadd.f32 %v4489_v58, %v997_v2  ;;  %2314 = vmatprep.subr.msk.mxu0 %vm101_vm0, %v3540_v1  ;;  %v2618_v14 = vpack.c.bf16 %v1984_v46, %v1983_v39  ;;  %v1968_v2 = vld [vmem:[%s4439_s3 + $0x8] sm:$0xff] }
 0x1d0   :  { %v3549_v38 = vmax.f32 %v1057_v5, 0.0  ;;  %v3551_v27 = vmax.f32 %v1060_v60, 0.0  ;;  %v2016_v5 = vld [vmem:[%s4439_s3 + $0x188] sm:$0xff] }
 0x1d2   :  { %2315 = vmatpush1.msk.msra.mxu0 %vm101_vm0, %v3549_v38  ;;  %2323 = vmatprep.subr.msk.mxu1 %vm101_vm0, %v3551_v27 }
 0x1d3   :  { %2316 = vmatmul.mubr.msk.f32.vlgmr.msra.gmra.mrb[42].mxu0 %vm79_vm1, %v2688_v40  ;;  %2324 = vmatpush1.msk.msra.mxu1 %vm101_vm0, %v3553_v9 }
 0x1d4   :  { %2571 = vmatprep.subr.bf16.mxu0 %v3367_v21  ;;  %2325 = vmatmul.mubr.msk.f32.vlgmr.msra.gmra.mrb[42].mxu1 %vm79_vm1, %v2688_v40  ;;  %v2000_v40 = vld [vmem:[%s4439_s3 + $0x108] sm:$0xff] }
 0x1d5   :  { %2573 = vmatpush1.bf16.msra.mxu0 %v3363_v37  ;;  %2583 = vmatprep.subr.bf16.mxu1 %v3395_v59 }
 0x1d6   :  { %2575 = vmatprep.subr.bf16.mxu0 %v3443_v31  ;;  %2585 = vmatpush1.bf16.msra.mxu1 %v3393_v3 }
 0x1d7   :  { %1171 = vmatprep.mubr.f32.mxu0 %v4490_v44  ;;  %2587 = vmatprep.subr.bf16.mxu1 %v3459_v10 }
 0x1d8   :  { %2317 = vmatmul.mubr.msk.f32.gmra.mrb[44].mxu0 %vm79_vm1, %v2689_v51  ;;  %1278 = vmatprep.mubr.f32.mxu1 %v4490_v44 }
 0x1d9   :  { %2326 = vmatmul.mubr.msk.f32.gmra.mrb[44].mxu1 %vm79_vm1, %v2689_v51  ;;  %2577 = vmatpush1.bf16.msra.mxu0 %v3439_v8 }
 0x1da   :  { %2579 = vmatprep.subr.bf16.mxu0 %v3514_v52  ;;  %2589 = vmatpush1.bf16.msra.mxu1 %v3457_v7 }
 0x1db   :  { %1177 = vmatprep.mubr.f32.mxu0 %v4490_v44  ;;  %2591 = vmatprep.subr.bf16.mxu1 %v3538_v23 }
 0x1dc   :  { %2318 = vmatmul.mubr.msk.f32.gmra.mrb[46].mxu0 %vm79_vm1, %v2690_v43  ;;  %1284 = vmatprep.mubr.f32.mxu1 %v4490_v44 }
 0x1dd   :  { %2327 = vmatmul.mubr.msk.f32.gmra.mrb[46].mxu1 %vm79_vm1, %v2690_v43  ;;  %2581 = vmatpush1.bf16.msra.mxu0 %v3509_v11  ;;  %v1985_v43 = vld [vmem:[%s4439_s3 + $0x90] sm:$0xff] }
 0x1de   :  { %2332 = vmatprep.subr.msk.mxu0 %vm101_vm0, %v3540_v1  ;;  %2593 = vmatpush1.bf16.msra.mxu1 %v3531_v26 }
 0x1df   :  { %1183 = vmatprep.mubr.f32.mxu0 %v4490_v44  ;;  %2341 = vmatprep.subr.msk.mxu1 %vm101_vm0, %v3551_v27 }
 0x1e0   :  { %2319 = vmatmul.mubr.msk.f32.gmra.mrb[48].mxu0 %vm79_vm1, %v2691_v47  ;;  %1290 = vmatprep.mubr.f32.mxu1 %v4490_v44 }
 0x1e1   :  { %2328 = vmatmul.mubr.msk.f32.gmra.mrb[48].mxu1 %vm79_vm1, %v2691_v47  ;;  %2333 = vmatpush1.msk.msra.mxu0 %vm101_vm0, %v3549_v38  ;;  %v1986_v47 = vld [vmem:[%s4439_s3 + $0x98] sm:$0xff] }
 0x1e2   :  { %2342 = vmatpush1.msk.msra.mxu1 %vm101_vm0, %v3553_v9  ;;  %2595 = vmatprep.subr.bf16.mxu0 %v3367_v21  ;;  %v2693_v21 = vld [vmem:[%s4437_s1 + $0x60] sm:$0xff] }
 0x1e3   :  { %1189 = vmatprep.mubr.f32.mxu0 %v4490_v44  ;;  %2607 = vmatprep.subr.bf16.mxu1 %v3395_v59  ;;  %v2694_v59 = vld [vmem:[%s4437_s1 + $0x68] sm:$0x3] }
 0x1e4   :  { %2320 = vmatmul.mubr.msk.f32.gmra.mrb[50].mxu0 %vm79_vm1, %v2692_v50  ;;  %1296 = vmatprep.mubr.f32.mxu1 %v4490_v44 }
 0x1e5   :  { %2329 = vmatmul.mubr.msk.f32.gmra.mrb[50].mxu1 %vm79_vm1, %v2692_v50  ;;  %1195 = vmatprep.mubr.f32.mxu0 %v4490_v44 }
 0x1e6   :  { %1302 = vmatprep.mubr.f32.mxu1 %v4490_v44 }
 0x1e8   :  { %2321 = vmatmul.mubr.msk.f32.gmra.mrb[52].mxu0 %vm79_vm1, %v2693_v21 }
 0x1e9   :  { %2330 = vmatmul.mubr.msk.f32.gmra.mrb[52].mxu1 %vm79_vm1, %v2693_v21  ;;  %1201 = vmatprep.mubr.f32.mxu0 %v4490_v44 }
 0x1ea   :  { %1308 = vmatprep.mubr.f32.mxu1 %v4490_v44 }
 0x1ec   :  { %2322 = vmatmul.mubr.msk.f32.gmra.mrb[54].mxu0 %vm79_vm1, %v2694_v59 }
 0x1ed   :  { %2331 = vmatmul.mubr.msk.f32.gmra.mrb[54].mxu1 %vm79_vm1, %v2694_v59  ;;  %1379 = vmatprep.mubr.f32.mxu0 %v4490_v44  ;;  %v2622_v59 = vpack.c.bf16 %v1986_v47, %v1985_v43  ;;  %v1975_v43 = vld [vmem:[%s4439_s3 + $0x40] sm:$0xff] }
 0x1ee   :  { %1486 = vmatprep.mubr.f32.mxu1 %v4490_v44 }
 0x1f0   :  { %2334 = vmatmul.mubr.msk.f32.vlgmr.msra.gmra.mrb[56].mxu0 %vm79_vm1, %v2695_v49 }
 0x1f1   :  { %2597 = vmatpush1.bf16.msra.mxu0 %v3363_v37  ;;  %2343 = vmatmul.mubr.msk.f32.vlgmr.msra.gmra.mrb[56].mxu1 %vm79_vm1, %v2695_v49  ;;  %v2697_v37 = vld [vmem:[%s4437_s1 + $0x80] sm:$0xff]  ;;  %v1969_v49 = vld [vmem:[%s4439_s3 + $0x10] sm:$0xff] }
 0x1f2   :  { %2599 = vmatprep.subr.bf16.mxu0 %v3443_v31  ;;  %2609 = vmatpush1.bf16.msra.mxu1 %v3393_v3  ;;  %v2698_v3 = vld [vmem:[%s4437_s1 + $0x88] sm:$0xff]  ;;  %v2700_v31 = vld [vmem:[%s4437_s1 + $0x98] sm:$0xff] }
 0x1f3   :  { %2611 = vmatprep.subr.bf16.mxu1 %v3459_v10  ;;  %1385 = vmatprep.mubr.f32.mxu0 %v4490_v44  ;;  %v2702_v10 = vld [vmem:[%s4437_s1] sm:$0xff] }
 0x1f4   :  { %2335 = vmatmul.mubr.msk.f32.gmra.mrb[58].mxu0 %vm79_vm1, %v2696_v55  ;;  %1492 = vmatprep.mubr.f32.mxu1 %v4490_v44 }
 0x1f5   :  { %2601 = vmatpush1.bf16.msra.mxu0 %v3439_v8  ;;  %2344 = vmatmul.mubr.msk.f32.gmra.mrb[58].mxu1 %vm79_vm1, %v2696_v55  ;;  %v2699_v8 = vld [vmem:[%s4437_s1 + $0x90] sm:$0xff]  ;;  %v1970_v55 = vld [vmem:[%s4439_s3 + $0x18] sm:$0xff] }
 0x1f6   :  { %2603 = vmatprep.subr.bf16.mxu0 %v3514_v52  ;;  %2613 = vmatpush1.bf16.msra.mxu1 %v3457_v7  ;;  %v2701_v7 = vld [vmem:[%s4437_s1 + $0xa0] sm:$0x3] }
 0x1f7   :  { %2615 = vmatprep.subr.bf16.mxu1 %v3538_v23  ;;  %1391 = vmatprep.mubr.f32.mxu0 %v4490_v44 }
 0x1f8   :  { %2336 = vmatmul.mubr.msk.f32.gmra.mrb[60].mxu0 %vm79_vm1, %v2697_v37  ;;  %1498 = vmatprep.mubr.f32.mxu1 %v4490_v44 }
 0x1f9   :  { %2605 = vmatpush1.bf16.msra.mxu0 %v3509_v11  ;;  %2345 = vmatmul.mubr.msk.f32.gmra.mrb[60].mxu1 %vm79_vm1, %v2697_v37  ;;  %v2708_v11 = vld [vmem:[%s4437_s1 + $0x30] sm:$0x3] }
 0x1fa   :  { %2350 = vmatprep.subr.msk.mxu0 %vm101_vm0, %v3540_v1  ;;  %2617 = vmatpush1.bf16.msra.mxu1 %v3531_v26  ;;  %v2017_v37 = vld [vmem:[%s4439_s3 + $0x190] sm:$0xff] }
 0x1fb   :  { %2359 = vmatprep.subr.msk.mxu1 %vm101_vm0, %v3551_v27  ;;  %1397 = vmatprep.mubr.f32.mxu0 %v4490_v44  ;;  %v2650_v27 = vpack.c.bf16 %v2016_v5, %v2015_v4  ;;  %v2022_v4 = vld [vmem:[%s4439_s3 + $0x1b8] sm:$0xff]  ;;  %v2005_v5 = vld [vmem:[%s4439_s3 + $0x130] sm:$0xff] }
 0x1fc   :  { %2337 = vmatmul.mubr.msk.f32.gmra.mrb[62].mxu0 %vm79_vm1, %v2698_v3  ;;  %1504 = vmatprep.mubr.f32.mxu1 %v4490_v44 }
 0x1fd   :  { %2351 = vmatpush1.msk.msra.mxu0 %vm101_vm0, %v3549_v38  ;;  %2346 = vmatmul.mubr.msk.f32.gmra.mrb[62].mxu1 %vm79_vm1, %v2698_v3  ;;  %v2620_v38 = vpack.c.bf16 %v1968_v2, %v1967_v61  ;;  %v1974_v61 = vld [vmem:[%s4439_s3 + $0x38] sm:$0xff] }
 0x1fe   :  { %2360 = vmatpush1.msk.msra.mxu1 %vm101_vm0, %v3553_v9  ;;  %1403 = vmatprep.mubr.f32.mxu0 %v4490_v44  ;;  %v1999_v9 = vld [vmem:[%s4439_s3 + $0x100] sm:$0xff] }
 0x1ff   :  { %1510 = vmatprep.mubr.f32.mxu1 %v4490_v44  ;;  %2619 = vmatprep.subr.bf16.mxu0 %v2618_v14  ;;  %v2021_v14 = vld [vmem:[%s4439_s3 + $0x1b0] sm:$0xff] }
 0x200   :  { %2338 = vmatmul.mubr.msk.f32.gmra.mrb[64].mxu0 %vm79_vm1, %v2699_v8  ;;  %2651 = vmatprep.subr.bf16.mxu1 %v2650_v27  ;;  %v2662_v27 = vpack.c.bf16 %v2022_v4, %v2021_v14  ;;  %v1980_v4 = vld [vmem:[%s4439_s3 + $0x68] sm:$0xff] }
 0x201   :  { %2347 = vmatmul.mubr.msk.f32.gmra.mrb[64].mxu1 %vm79_vm1, %v2699_v8  ;;  %1409 = vmatprep.mubr.f32.mxu0 %v4490_v44  ;;  %v2624_v8 = vpack.c.bf16 %v1970_v55, %v1969_v49  ;;  %v1976_v49 = vld [vmem:[%s4439_s3 + $0x48] sm:$0xff]  ;;  %v2023_v55 = vld [vmem:[%s4439_s3 + $0x1c0] sm:$0xff] }
 0x202   :  { %1516 = vmatprep.mubr.f32.mxu1 %v4490_v44 }
 0x204   :  { %2339 = vmatmul.mubr.msk.f32.gmra.mrb[66].mxu0 %vm79_vm1, %v2700_v31 }
 0x205   :  { %2348 = vmatmul.mubr.msk.f32.gmra.mrb[66].mxu1 %vm79_vm1, %v2700_v31  ;;  %1415 = vmatprep.mubr.f32.mxu0 %v4490_v44  ;;  %v2018_v31 = vld [vmem:[%s4439_s3 + $0x198] sm:$0xff] }
 0x206   :  { %1522 = vmatprep.mubr.f32.mxu1 %v4490_v44 }
 0x208   :  { %2340 = vmatmul.mubr.msk.f32.gmra.mrb[68].mxu0 %vm79_vm1, %v2701_v7 }
 0x209   :  { %2349 = vmatmul.mubr.msk.f32.gmra.mrb[68].mxu1 %vm79_vm1, %v2701_v7  ;;  %1677 = vmatprep.mubr.f32.mxu0 %v4490_v44  ;;  %v2001_v7 = vld [vmem:[%s4439_s3 + $0x110] sm:$0xff] }
 0x20a   :  { %1784 = vmatprep.mubr.f32.mxu1 %v4490_v44 }
 0x20c   :  { %2352 = vmatmul.mubr.msk.f32.vlgmr.msra.gmra.mrb[70].mxu0 %vm79_vm1, %v2702_v10 }
 0x20d   :  { %2361 = vmatmul.mubr.msk.f32.vlgmr.msra.gmra.mrb[70].mxu1 %vm79_vm1, %v2702_v10  ;;  %1683 = vmatprep.mubr.f32.mxu0 %v4490_v44  ;;  %v2002_v10 = vld [vmem:[%s4439_s3 + $0x118] sm:$0xff] }
 0x20e   :  { %1790 = vmatprep.mubr.f32.mxu1 %v4490_v44  ;;  %2621 = vmatpush3.bf16.msra.mxu0 %v2620_v38  ;;  %v2006_v38 = vld [vmem:[%s4439_s3 + $0x138] sm:$0xff] }
 0x20f   :  { %2623 = vmatprep.subr.bf16.mxu0 %v2622_v59 }
 0x210   :  { %2353 = vmatmul.mubr.msk.f32.gmra.mrb[72].mxu0 %vm79_vm1, %v2703_v22 }
 0x211   :  { %2362 = vmatmul.mubr.msk.f32.gmra.mrb[72].mxu1 %vm79_vm1, %v2703_v22  ;;  %1689 = vmatprep.mubr.f32.mxu0 %v4490_v44  ;;  %v2654_v22 = vpack.c.bf16 %v2018_v31, %v2017_v37  ;;  %v2024_v37 = vld [vmem:[%s4439_s3 + $0x1c8] sm:$0xff]  ;;  %v2636_v31 = vpack.c.bf16 %v1976_v49, %v1975_v43  ;;  %v2011_v43 = vld [vmem:[%s4439_s3 + $0x160] sm:$0xff] }
 0x212   :  { %1796 = vmatprep.mubr.f32.mxu1 %v4490_v44  ;;  %2625 = vmatpush3.bf16.msra.mxu0 %v2624_v8 }
 0x214   :  { %2354 = vmatmul.mubr.msk.f32.gmra.mrb[74].mxu0 %vm79_vm1, %v2704_v6 }
 0x215   :  { %2363 = vmatmul.mubr.msk.f32.gmra.mrb[74].mxu1 %vm79_vm1, %v2704_v6  ;;  %1695 = vmatprep.mubr.f32.mxu0 %v4490_v44  ;;  %v2656_v6 = vpack.c.bf16 %v2002_v10, %v2001_v7  ;;  %v2666_v7 = vpack.c.bf16 %v2024_v37, %v2023_v55  ;;  %v1997_v55 = vld [vmem:[%s4439_s3 + $0xf0] sm:$0xff]  ;;  %v1998_v37 = vld [vmem:[%s4439_s3 + $0xf8] sm:$0xff] }
 0x216   :  { %1802 = vmatprep.mubr.f32.mxu1 %v4490_v44 }
 0x218   :  { %2355 = vmatmul.mubr.msk.f32.gmra.mrb[76].mxu0 %vm79_vm1, %v2705_v42 }
 0x219   :  { %2364 = vmatmul.mubr.msk.f32.gmra.mrb[76].mxu1 %vm79_vm1, %v2705_v42  ;;  %1701 = vmatprep.mubr.f32.mxu0 %v4490_v44  ;;  %v1987_v42 = vld [vmem:[%s4439_s3 + $0xa0] sm:$0xff] }
 0x21a   :  { %1808 = vmatprep.mubr.f32.mxu1 %v4490_v44 }
 0x21c   :  { %2356 = vmatmul.mubr.msk.f32.gmra.mrb[78].mxu0 %vm79_vm1, %v2706_v16 }
 0x21d   :  { %2365 = vmatmul.mubr.msk.f32.gmra.mrb[78].mxu1 %vm79_vm1, %v2706_v16  ;;  %1707 = vmatprep.mubr.f32.mxu0 %v4490_v44  ;;  %v1988_v16 = vld [vmem:[%s4439_s3 + $0xa8] sm:$0xff] }
 0x21e   :  { %1814 = vmatprep.mubr.f32.mxu1 %v4490_v44 }
 0x220   :  { %2357 = vmatmul.mubr.msk.f32.gmra.mrb[80].mxu0 %vm79_vm1, %v2707_v17 }
 0x221   :  { %2366 = vmatmul.mubr.msk.f32.gmra.mrb[80].mxu1 %vm79_vm1, %v2707_v17  ;;  %1713 = vmatprep.mubr.f32.mxu0 %v4490_v44  ;;  %v1971_v17 = vld [vmem:[%s4439_s3 + $0x20] sm:$0xff] }
 0x222   :  { %1820 = vmatprep.mubr.f32.mxu1 %v4490_v44  ;;  %v2652_v44 = vpack.c.bf16 %v2000_v40, %v1999_v9  ;;  %v2664_v9 = vpack.c.bf16 %v2006_v38, %v2005_v5  ;;  %v1991_v40 = vld [vmem:[%s4439_s3 + $0xc0] sm:$0xff]  ;;  %v2028_v38 = vld [vmem:[%s4439_s3 + $0x1e8] sm:$0xff] }
 0x223   :  { %v2027_v5 = vld [vmem:[%s4439_s3 + $0x1e0] sm:$0xff] }
 0x224   :  { %2358 = vmatmul.mubr.msk.f32.gmra.mrb[82].mxu0 %vm79_vm1, %v2708_v11  ;;  %2653 = vmatpush3.bf16.msra.mxu1 %v2652_v44  ;;  %v1992_v44 = vld [vmem:[%s4439_s3 + $0xc8] sm:$0xff] }
 0x225   :  { %2367 = vmatmul.mubr.msk.f32.gmra.mrb[82].mxu1 %vm79_vm1, %v2708_v11  ;;  %2655 = vmatprep.subr.bf16.mxu1 %v2654_v22  ;;  %v2634_v59 = vpack.c.bf16 %v1992_v44, %v1991_v40  ;;  %v2007_v22 = vld [vmem:[%s4439_s3 + $0x140] sm:$0xff]  ;;  %v2674_v40 = vpack.c.bf16 %v2028_v38, %v2027_v5 }
 0x228   :  { %2657 = vmatpush3.bf16.msra.mxu1 %v2656_v6  ;;  %v2008_v6 = vld [vmem:[%s4439_s3 + $0x148] sm:$0xff] }
 0x2a6   :  { %v1167_v41 = vpop.f32.mrb[42].mxu0 }
 0x2a7   :  { %v1274_v33 = vpop.f32.mrb[42].mxu1  ;;  %1529 = vrot.lane.b32.xlu1 %v1167_v41, %s2711_s26  ;;  %v1169_v12 = vpop.f32.mrb[43].mxu0  ;;  %v2626_v41 = vpack.c.bf16 %v1988_v16, %v1987_v42  ;;  %v1993_v16 = vld [vmem:[%s4439_s3 + $0xd0] sm:$0xff] }
 0x2a8   :  { %1557 = vrot.lane.b32.xlu0 %v1274_v33, %s2711_s26  ;;  %v1276_v52 = vpop.f32.mrb[43].mxu1  ;;  %v1972_v33 = vld [vmem:[%s4439_s3 + $0x28] sm:$0xff] }
 0x2a9   :  { %2627 = vmatprep.subr.bf16.mxu0 %v2626_v41 }
 0x2ab   :  { %1543 = vrot.lane.b32.xlu1 %v1169_v12, %s2711_s26  ;;  %v1173_v57 = vpop.f32.mrb[44].mxu0  ;;  %v2019_v12 = vld [vmem:[%s4439_s3 + $0x1a0] sm:$0xff] }
 0x2ac   :  { %1571 = vrot.lane.b32.xlu0 %v1276_v52, %s2711_s26  ;;  %v1280_v0 = vpop.f32.mrb[44].mxu1  ;;  %v1175_v13 = vpop.f32.mrb[45].mxu0  ;;  %v2020_v52 = vld [vmem:[%s4439_s3 + $0x1a8] sm:$0xff] }
 0x2ad   :  { %v1282_v63 = vpop.f32.mrb[45].mxu1 }
 0x2af   :  { %1559 = vrot.lane.b32.xlu1 %v1280_v0, %s2711_s26  ;;  %v1179_v25 = vpop.f32.mrb[46].mxu0 }
 0x2b0   :  { %1545 = vrot.lane.b32.xlu0 %v1175_v13, %s2711_s26  ;;  %v1286_v56 = vpop.f32.mrb[46].mxu1  ;;  %v1181_v62 = vpop.f32.mrb[47].mxu0  ;;  %v2628_v13 = vpack.c.bf16 %v1972_v33, %v1971_v17  ;;  %v1994_v17 = vld [vmem:[%s4439_s3 + $0xd8] sm:$0xff] }
 0x2b1   :  { %v1288_v45 = vpop.f32.mrb[47].mxu1 }
 0x2b2   :  { %2629 = vmatpush3.bf16.msra.mxu0 %v2628_v13  ;;  %v2025_v13 = vld [vmem:[%s4439_s3 + $0x1d0] sm:$0xff] }
 0x2b3   :  { %1531 = vrot.lane.b32.xlu1 %v1173_v57, %s2711_s26  ;;  %v1185_v34 = vpop.f32.mrb[48].mxu0 }
 0x2b4   :  { %1573 = vrot.lane.b32.xlu0 %v1282_v63, %s2711_s26  ;;  %v1292_v36 = vpop.f32.mrb[48].mxu1  ;;  %v1187_v48 = vpop.f32.mrb[49].mxu0  ;;  %v2658_v63 = vpack.c.bf16 %v2020_v52, %v2019_v12  ;;  %v2638_v12 = vpack.c.bf16 %v1994_v17, %v1993_v16  ;;  %v1978_v52 = vld [vmem:[%s4439_s3 + $0x58] sm:$0xff] }
 0x2b5   :  { %v1294_v20 = vpop.f32.mrb[49].mxu1  ;;  %v2030_v17 = vld [vmem:[%s4439_s3 + $0x1f8] sm:$0xff] }
 0x2b6   :  { %2659 = vmatprep.subr.bf16.mxu1 %v2658_v63 }
 0x2b7   :  { %1561 = vrot.lane.b32.xlu1 %v1286_v56, %s2711_s26  ;;  %v3755_v53 = vpop.f32.mrb[50].mxu0  ;;  %v2003_v56 = vld [vmem:[%s4439_s3 + $0x120] sm:$0xff] }
 0x2b8   :  { %1547 = vrot.lane.b32.xlu0 %v1181_v62, %s2711_s26  ;;  %v3758_v35 = vpop.f32.mrb[50].mxu1  ;;  %v3760_v24 = vpop.f32.mrb[51].mxu0  ;;  %v2004_v62 = vld [vmem:[%s4439_s3 + $0x128] sm:$0xff] }
 0x2b9   :  { %v3762_v26 = vpop.f32.mrb[51].mxu1 }
 0x2bb   :  { %1533 = vrot.lane.b32.xlu1 %v1179_v25, %s2711_s26  ;;  %v3765_v18 = vpop.f32.mrb[52].mxu0 }
 0x2bc   :  { %1575 = vrot.lane.b32.xlu0 %v1288_v45, %s2711_s26  ;;  %v3777_v23 = vpop.f32.mrb[52].mxu1  ;;  %v3779_v1 = vpop.f32.mrb[53].mxu0  ;;  %v2660_v45 = vpack.c.bf16 %v2004_v62, %v2003_v56  ;;  %v2026_v56 = vld [vmem:[%s4439_s3 + $0x1d8] sm:$0xff]  ;;  %v2009_v62 = vld [vmem:[%s4439_s3 + $0x150] sm:$0xff] }
 0x2bd   :  { %v3790_v60 = vpop.f32.mrb[53].mxu1 }
 0x2be   :  { %2661 = vmatpush3.bf16.msra.mxu1 %v2660_v45  ;;  %v2010_v45 = vld [vmem:[%s4439_s3 + $0x158] sm:$0xff] }
 0x2bf   :  { %1563 = vrot.lane.b32.xlu1 %v1292_v36, %s2711_s26  ;;  %v3799_v51 = vpop.f32.mrb[54].mxu0  ;;  %v1989_v36 = vld [vmem:[%s4439_s3 + $0xb0] sm:$0xff]  ;;  %2663 = vmatprep.subr.bf16.mxu1 %v2662_v27 }
 0x2c0   :  { %1549 = vrot.lane.b32.xlu0 %v1187_v48, %s2711_s26  ;;  %v3808_v50 = vpop.f32.mrb[54].mxu1  ;;  %v3810_v21 = vpop.f32.mrb[55].mxu0  ;;  %v1990_v48 = vld [vmem:[%s4439_s3 + $0xb8] sm:$0xff] }
 0x2c1   :  { %v3821_v3 = vpop.f32.mrb[55].mxu1  ;;  %v2630_v46 = vpack.c.bf16 %v1990_v48, %v1989_v36  ;;  %v2670_v36 = vpack.c.bf16 %v2026_v56, %v2025_v13  ;;  %v2672_v48 = vpack.c.bf16 %v2010_v45, %v2009_v62 }
 0x2c2   :  { %2665 = vmatpush3.bf16.msra.mxu1 %v2664_v9 }
 0x2c3   :  { %1535 = vrot.lane.b32.xlu1 %v1185_v34, %s2711_s26  ;;  %v3842_v11 = vpop.f32.mrb[56].mxu0  ;;  %2631 = vmatprep.subr.bf16.mxu0 %v2630_v46  ;;  %v1995_v46 = vld [vmem:[%s4439_s3 + $0xe0] sm:$0xff] }
 0x2c4   :  { %1577 = vrot.lane.b32.xlu0 %v1294_v20, %s2711_s26  ;;  %v3854_v57 = vpop.f32.mrb[56].mxu1  ;;  %v3856_v0 = vpop.f32.mrb[57].mxu0  ;;  %2667 = vmatprep.subr.bf16.mxu1 %v2666_v7 }
 0x2c5   :  { %v3858_v25 = vpop.f32.mrb[57].mxu1 }
 0x2c7   :  { %1565 = vrot.lane.b32.xlu1 %v3758_v35, %s2711_s26  ;;  %v3868_v34 = vpop.f32.mrb[58].mxu0  ;;  %v1973_v35 = vld [vmem:[%s4439_s3 + $0x30] sm:$0xff] }
 0x2c8   :  { %1551 = vrot.lane.b32.xlu0 %v3760_v24, %s2711_s26  ;;  %v3878_v20 = vpop.f32.mrb[58].mxu1  ;;  %v3880_v39 = vpop.f32.mrb[59].mxu0  ;;  %v2632_v24 = vpack.c.bf16 %v1974_v61, %v1973_v35  ;;  %v1996_v35 = vld [vmem:[%s4439_s3 + $0xe8] sm:$0xff]  ;;  %v1979_v61 = vld [vmem:[%s4439_s3 + $0x60] sm:$0xff] }
 0x2c9   :  { %v3891_v2 = vpop.f32.mrb[59].mxu1  ;;  %v2644_v9 = vpack.c.bf16 %v1980_v4, %v1979_v61 }
 0x2ca   :  { %2633 = vmatpush3.bf16.msra.mxu0 %v2632_v24  ;;  %v2642_v24 = vpack.c.bf16 %v1996_v35, %v1995_v46 }
 0x2cb   :  { %1537 = vrot.lane.b32.xlu1 %v3755_v53, %s2711_s26  ;;  %v3913_v47 = vpop.f32.mrb[60].mxu0  ;;  %2635 = vmatprep.subr.bf16.mxu0 %v2634_v59  ;;  %v2012_v59 = vld [vmem:[%s4439_s3 + $0x168] sm:$0xff] }
 0x2cc   :  { %1579 = vrot.lane.b32.xlu0 %v3762_v26, %s2711_s26  ;;  %v3926_v53 = vpop.f32.mrb[60].mxu1  ;;  %v3928_v8 = vpop.f32.mrb[61].mxu0  ;;  %v2668_v26 = vpack.c.bf16 %v2008_v6, %v2007_v22  ;;  %v2646_v22 = vpack.c.bf16 %v1998_v37, %v1997_v55  ;;  %v1982_v6 = vld [vmem:[%s4439_s3 + $0x78] sm:$0xff] }
 0x2cd   :  { %v3930_v10 = vpop.f32.mrb[61].mxu1 }
 0x2ce   :  { %2637 = vmatpush3.bf16.msra.mxu0 %v2636_v31  ;;  %2669 = vmatpush3.bf16.msra.mxu1 %v2668_v26  ;;  %v2029_v26 = vld [vmem:[%s4439_s3 + $0x1f0] sm:$0xff] }
 0x2cf   :  { %1567 = vrot.lane.b32.xlu1 %v3777_v23, %s2711_s26  ;;  %v3940_v42 = vpop.f32.mrb[62].mxu0  ;;  %v1977_v23 = vld [vmem:[%s4439_s3 + $0x50] sm:$0xff]  ;;  %2639 = vmatprep.subr.bf16.mxu0 %v2638_v12 }
 0x2d0   :  { %1553 = vrot.lane.b32.xlu0 %v3779_v1, %s2711_s26  ;;  %v3950_v41 = vpop.f32.mrb[62].mxu1  ;;  %v3952_v33 = vpop.f32.mrb[63].mxu0  ;;  %v2640_v1 = vpack.c.bf16 %v1978_v52, %v1977_v23  ;;  %2671 = vmatprep.subr.bf16.mxu1 %v2670_v36  ;;  %v2013_v12 = vld [vmem:[%s4439_s3 + $0x170] sm:$0xff]  ;;  %v2014_v23 = vld [vmem:[%s4439_s3 + $0x178] sm:$0xff]  ;;  %v2678_v52 = vpack.c.bf16 %v2030_v17, %v2029_v26 }
 0x2d1   :  { %v3963_v63 = vpop.f32.mrb[63].mxu1  ;;  %v2680_v13 = vpack.c.bf16 %v2014_v23, %v2013_v12 }
 0x2d2   :  { %2641 = vmatpush3.bf16.msra.mxu0 %v2640_v1  ;;  %2673 = vmatpush3.bf16.msra.mxu1 %v2672_v48 }
 0x2d3   :  { %1539 = vrot.lane.b32.xlu1 %v3765_v18, %s2711_s26  ;;  %v3985_v14 = vpop.f32.mrb[64].mxu0  ;;  %2643 = vmatprep.subr.bf16.mxu0 %v2642_v24 }
 0x2d4   :  { %1581 = vrot.lane.b32.xlu0 %v3790_v60, %s2711_s26  ;;  %v3998_v18 = vpop.f32.mrb[64].mxu1  ;;  %v4000_v27 = vpop.f32.mrb[65].mxu0  ;;  %2675 = vmatprep.subr.bf16.mxu1 %v2674_v40  ;;  %v2676_v60 = vpack.c.bf16 %v2012_v59, %v2011_v43 }
 0x2d5   :  { %v4002_v44 = vpop.f32.mrb[65].mxu1 }
 0x2d6   :  { %2645 = vmatpush3.bf16.msra.mxu0 %v2644_v9  ;;  %2677 = vmatpush3.bf16.msra.mxu1 %v2676_v60 }
 0x2d7   :  { %1569 = vrot.lane.b32.xlu1 %v3808_v50, %s2711_s26  ;;  %v4012_v49 = vpop.f32.mrb[66].mxu0  ;;  %v1981_v50 = vld [vmem:[%s4439_s3 + $0x70] sm:$0xff]  ;;  %2647 = vmatprep.subr.bf16.mxu0 %v2646_v22 }
 0x2d8   :  { %1555 = vrot.lane.b32.xlu0 %v3810_v21, %s2711_s26  ;;  %v4022_v31 = vpop.f32.mrb[66].mxu1  ;;  %v4024_v7 = vpop.f32.mrb[67].mxu0  ;;  %v2648_v21 = vpack.c.bf16 %v1982_v6, %v1981_v50  ;;  %2679 = vmatprep.subr.bf16.mxu1 %v2678_v52 }
 0x2d9   :  { %v4035_v16 = vpop.f32.mrb[67].mxu1 }
 0x2da   :  { %2649 = vmatpush3.bf16.msra.mxu0 %v2648_v21  ;;  %2681 = vmatpush3.bf16.msra.mxu1 %v2680_v13 }
 0x2db   :  { %1541 = vrot.lane.b32.xlu1 %v3799_v51, %s2711_s26  ;;  %v1417_v1 = vpop.f32.mrb[68].mxu0 }
 0x2dc   :  { %1583 = vrot.lane.b32.xlu0 %v3821_v3, %s2711_s26  ;;  %v1419_v56 = vpop.f32.mrb[69].mxu0  ;;  %v1524_v62 = vpop.f32.mrb[68].mxu1 }
 0x2dd   :  { %v1526_v45 = vpop.f32.mrb[69].mxu1 }
 0x2df   :  { %1827 = vrot.lane.b32.xlu1 %v3842_v11, %s2712_s27  ;;  %v4052_v36 = vpop.f32.mrb[70].mxu0 }
 0x2e0   :  { %1855 = vrot.lane.b32.xlu0 %v3854_v57, %s2712_s27  ;;  %v4056_v48 = vpop.f32.mrb[70].mxu1  ;;  %v4058_v51 = vpop.f32.mrb[71].mxu0 }
 0x2e1   :  { %v4060_v46 = vpop.f32.mrb[71].mxu1 }
 0x2e3   :  { %1841 = vrot.lane.b32.xlu1 %v3856_v0, %s2712_s27  ;;  %v4064_v3 = vpop.f32.mrb[72].mxu0 }
 0x2e4   :  { %1869 = vrot.lane.b32.xlu0 %v3858_v25, %s2712_s27  ;;  %v4068_v11 = vpop.f32.mrb[72].mxu1  ;;  %v4070_v35 = vpop.f32.mrb[73].mxu0 }
 0x2e5   :  { %v4072_v61 = vpop.f32.mrb[73].mxu1 }
 0x2e7   :  { %1829 = vrot.lane.b32.xlu1 %v3868_v34, %s2712_s27  ;;  %v4076_v57 = vpop.f32.mrb[74].mxu0 }
 0x2e8   :  { %1857 = vrot.lane.b32.xlu0 %v3878_v20, %s2712_s27  ;;  %v4080_v0 = vpop.f32.mrb[74].mxu1  ;;  %v4082_v24 = vpop.f32.mrb[75].mxu0 }
 0x2e9   :  { %v4084_v4 = vpop.f32.mrb[75].mxu1 }
 0x2eb   :  { %1843 = vrot.lane.b32.xlu1 %v3880_v39, %s2712_s27  ;;  %v4088_v25 = vpop.f32.mrb[76].mxu0 }
 0x2ec   :  { %1871 = vrot.lane.b32.xlu0 %v3891_v2, %s2712_s27  ;;  %v4092_v34 = vpop.f32.mrb[76].mxu1  ;;  %v4094_v5 = vpop.f32.mrb[77].mxu0 }
 0x2ed   :  { %v4096_v38 = vpop.f32.mrb[77].mxu1 }
 0x2ef   :  { %1831 = vrot.lane.b32.xlu1 %v3913_v47, %s2712_s27  ;;  %v4100_v20 = vpop.f32.mrb[78].mxu0 }
 0x2f0   :  { %1859 = vrot.lane.b32.xlu0 %v3926_v53, %s2712_s27  ;;  %v4104_v39 = vpop.f32.mrb[78].mxu1  ;;  %v4106_v9 = vpop.f32.mrb[79].mxu0 }
 0x2f1   :  { %v4108_v40 = vpop.f32.mrb[79].mxu1 }
 0x2f3   :  { %1845 = vrot.lane.b32.xlu1 %v3928_v8, %s2712_s27  ;;  %v4112_v2 = vpop.f32.mrb[80].mxu0 }
 0x2f4   :  { %4491 = vst [vmem:[#allocation3_spill] sm:$0xff] %v4112_v2  ;;  %1873 = vrot.lane.b32.xlu0 %v3930_v10, %s2712_s27  ;;  %v4116_v47 = vpop.f32.mrb[80].mxu1  ;;  %v4118_v43 = vpop.f32.mrb[81].mxu0 }
 0x2f5   :  { %4492 = vst [vmem:[#allocation15_spill] sm:$0xff] %v4116_v47  ;;  %4493 = vst [vmem:[#allocation9_spill] sm:$0xff] %v4118_v43  ;;  %v4120_v59 = vpop.f32.mrb[81].mxu1 }
 0x2f6   :  { %4494 = vst [vmem:[#allocation12_spill] sm:$0xff] %v4120_v59 }
 0x2f7   :  { %1833 = vrot.lane.b32.xlu1 %v3940_v42, %s2712_s27  ;;  %v4124_v53 = vpop.f32.mrb[82].mxu0 }
 0x2f8   :  { %4495 = vst [vmem:[#allocation14_spill] sm:$0xff] %v4124_v53  ;;  %1861 = vrot.lane.b32.xlu0 %v3950_v41, %s2712_s27  ;;  %v4128_v8 = vpop.f32.mrb[82].mxu1  ;;  %v4130_v60 = vpop.f32.mrb[83].mxu0 }
 0x2f9   :  { %4496 = vst [vmem:[#allocation13_spill] sm:$0xff] %v4128_v8  ;;  %4497 = vst [vmem:[#allocation4_spill] sm:$0xff] %v4130_v60  ;;  %v4132_v55 = vpop.f32.mrb[83].mxu1 }
 0x2fa   :  { %4498 = vst [vmem:[#allocation18_spill] sm:$0xff] %v4132_v55 }
 0x2fb   :  { %1847 = vrot.lane.b32.xlu1 %v3952_v33, %s2712_s27 }
 0x2fc   :  { %1875 = vrot.lane.b32.xlu0 %v3963_v63, %s2712_s27 }
 0x2ff   :  { %1835 = vrot.lane.b32.xlu1 %v3985_v14, %s2712_s27 }
 0x300   :  { %1863 = vrot.lane.b32.xlu0 %v3998_v18, %s2712_s27 }
 0x303   :  { %1849 = vrot.lane.b32.xlu1 %v4000_v27, %s2712_s27 }
 0x304   :  { %1877 = vrot.lane.b32.xlu0 %v4002_v44, %s2712_s27 }
 0x307   :  { %1837 = vrot.lane.b32.xlu1 %v4012_v49, %s2712_s27 }
 0x308   :  { %1865 = vrot.lane.b32.xlu0 %v4022_v31, %s2712_s27 }
 0x30b   :  { %1851 = vrot.lane.b32.xlu1 %v4024_v7, %s2712_s27 }
 0x30c   :  { %1879 = vrot.lane.b32.xlu0 %v4035_v16, %s2712_s27 }
 0x30f   :  { %1853 = vrot.lane.b32.xlu1 %v1419_v56, %s2712_s27 }
 0x310   :  { %1867 = vrot.lane.b32.xlu0 %v1524_v62, %s2712_s27 }
 0x313   :  { %1839 = vrot.lane.b32.xlu1 %v1417_v1, %s2712_s27 }
 0x314   :  { %1881 = vrot.lane.b32.xlu0 %v1526_v45, %s2712_s27 }
 0x319   :  { %v1530_v10 = vpop.permute.xlu1 %1529 }
 0x31a   :  { %v1558_v42 = vpop.permute.xlu0 %1557 }
 0x31d   :  { %v1544_v41 = vpop.permute.xlu1 %1543 }
 0x31e   :  { %v1572_v33 = vpop.permute.xlu0 %1571  ;;  %v1599_v55 = vsel %vm621_vm2, %v1530_v10, %v1544_v41  ;;  %v1592_v8 = vsel %vm621_vm2, %v1544_v41, %v1558_v42 }
 0x31f   :  { %v1585_v60 = vsel %vm621_vm2, %v1558_v42, %v1572_v33  ;;  %v1606_v15 = vsel %vm621_vm2, %v1572_v33, %v1530_v10 }
 0x320   :  { %v1789_v59 = vadd.f32 %v4060_v46, %v1606_v15 }
 0x321   :  { %v1560_v63 = vpop.permute.xlu1 %1559 }
 0x322   :  { %v1546_v14 = vpop.permute.xlu0 %1545 }
 0x325   :  { %v1532_v18 = vpop.permute.xlu1 %1531 }
 0x326   :  { %v1574_v27 = vpop.permute.xlu0 %1573 }
 0x329   :  { %v4158_v44 = vpop.permute.xlu1 %1561 }
 0x32a   :  { %v4160_v49 = vpop.permute.xlu0 %1547 }
 0x32d   :  { %v4162_v37 = vpop.permute.xlu1 %1533 }
 0x32e   :  { %v4164_v31 = vpop.permute.xlu0 %1575 }
 0x331   :  { %v4166_v7 = vpop.permute.xlu1 %1563 }
 0x332   :  { %v4168_v22 = vpop.permute.xlu0 %1549 }
 0x335   :  { %v4170_v50 = vpop.permute.xlu1 %1535 }
 0x336   :  { %v4172_v6 = vpop.permute.xlu0 %1577 }
 0x339   :  { %v4174_v26 = vpop.permute.xlu1 %1565 }
 0x33a   :  { %v4176_v16 = vpop.permute.xlu0 %1551 }
 0x33d   :  { %v4178_v21 = vpop.permute.xlu1 %1537 }
 0x33e   :  { %v4180_v17 = vpop.permute.xlu0 %1579 }
 0x341   :  { %v4182_v12 = vpop.permute.xlu1 %1567 }
 0x342   :  { %v4184_v23 = vpop.permute.xlu0 %1553 }
 0x345   :  { %v4186_v52 = vpop.permute.xlu1 %1539 }
 0x346   :  { %v4188_v13 = vpop.permute.xlu0 %1581 }
 0x349   :  { %v4190_v1 = vpop.permute.xlu1 %1569 }
 0x34a   :  { %4499 = vst [vmem:[#allocation16_spill] sm:$0xff] %v4190_v1  ;;  %v4192_v56 = vpop.permute.xlu0 %1555 }
 0x34b   :  { %4500 = vst [vmem:[#allocation6_spill] sm:$0xff] %v4192_v56  ;;  %v1680_v56 = vadd.f32 %v4052_v36, %v1599_v55  ;;  %v1593_v55 = vsel %vm621_vm2, %v1546_v14, %v1560_v63 }
 0x34d   :  { %v4194_v62 = vpop.permute.xlu1 %1541 }
 0x34e   :  { %4501 = vst [vmem:[#allocation7_spill] sm:$0xff] %v4194_v62  ;;  %v4196_v45 = vpop.permute.xlu0 %1583  ;;  %v1682_v62 = vadd.f32 %v4058_v51, %v1592_v8 }
 0x34f   :  { %4502 = vst [vmem:[#allocation17_spill] sm:$0xff] %v4196_v45  ;;  %v1787_v45 = vadd.f32 %v4056_v48, %v1585_v60  ;;  %v1600_v60 = vsel %vm621_vm2, %v1532_v18, %v1546_v14 }
 0x351   :  { %v1828_v58 = vpop.permute.xlu1 %1827 }
 0x352   :  { %v1856_v53 = vpop.permute.xlu0 %1855 }
 0x355   :  { %v1842_v1 = vpop.permute.xlu1 %1841 }
 0x356   :  { %v1890_v43 = vsel %vm941_vm3, %v1842_v1, %v1856_v53  ;;  %v1897_v41 = vsel %vm941_vm3, %v1828_v58, %v1842_v1  ;;  %v1870_v47 = vpop.permute.xlu0 %1869 }
 0x357   :  { %v1911_v42 = vadd.f32 %v1897_v41, %v1680_v56  ;;  %v1912_v2 = vadd.f32 %v1890_v43, %v1682_v62  ;;  %v1883_v10 = vsel %vm941_vm3, %v1856_v53, %v1870_v47  ;;  %v1904_v36 = vsel %vm941_vm3, %v1870_v47, %v1828_v58 }
 0x358   :  { %v1913_v51 = vadd.f32 %v1883_v10, %v1787_v45  ;;  %v1914_v8 = vadd.f32 %v1904_v36, %v1789_v59  ;;  %v1586_v58 = vsel %vm621_vm2, %v1560_v63, %v1574_v27  ;;  %v1607_v47 = vsel %vm621_vm2, %v1574_v27, %v1532_v18 }
 0x359   :  { %v1939_v48 = vadd.f32 %v1911_v42, %v3216_v28  ;;  %v1830_v15 = vpop.permute.xlu1 %1829  ;;  %v1940_v46 = vadd.f32 %v1912_v2, %v3216_v28  ;;  %v1686_v2 = vadd.f32 %v4064_v3, %v1600_v60  ;;  %v1688_v59 = vadd.f32 %v4070_v35, %v1593_v55 }
 0x35a   :  { %v1941_v43 = vadd.f32 %v1913_v51, %v3216_v28  ;;  %v1858_v33 = vpop.permute.xlu0 %1857  ;;  %v1942_v53 = vadd.f32 %v1914_v8, %v3216_v28  ;;  %v1793_v1 = vadd.f32 %v4068_v11, %v1586_v58  ;;  %v1795_v56 = vadd.f32 %v4072_v61, %v1607_v47 }
 0x35b   :  { %2097 = vmatprep.mubr.f32.mxu0 %v1940_v46  ;;  %v1601_v10 = vsel %vm621_vm2, %v4162_v37, %v4160_v49  ;;  %v1594_v36 = vsel %vm621_vm2, %v4160_v49, %v4158_v44  ;;  %v1608_v46 = vsel %vm621_vm2, %v4164_v31, %v4162_v37 }
 0x35c   :  { %2098 = vmatmul.mubr.f32.vlgmr.msra.gmra.mrb[84].mxu0 %v1939_v48  ;;  %2197 = vmatprep.mubr.f32.mxu1 %v1942_v53  ;;  %v1692_v49 = vadd.f32 %v4076_v57, %v1601_v10  ;;  %v1694_v60 = vadd.f32 %v4082_v24, %v1594_v36  ;;  %v1596_v10 = vsel %vm621_vm2, %v4176_v16, %v4174_v26 }
 0x35d   :  { %2198 = vmatmul.mubr.f32.vlgmr.msra.gmra.mrb[84].mxu1 %v1941_v43  ;;  %v1844_v14 = vpop.permute.xlu1 %1843  ;;  %v1801_v43 = vadd.f32 %v4084_v4, %v1608_v46  ;;  %v1706_v46 = vadd.f32 %v4106_v9, %v1596_v10 }
 0x35e   :  { %v1891_v28 = vsel %vm941_vm3, %v1844_v14, %v1858_v33  ;;  %v1898_v63 = vsel %vm941_vm3, %v1830_v15, %v1844_v14  ;;  %v1872_v18 = vpop.permute.xlu0 %1871  ;;  %v1595_v14 = vsel %vm621_vm2, %v4168_v22, %v4166_v7 }
 0x35f   :  { %v1915_v27 = vadd.f32 %v1898_v63, %v1686_v2  ;;  %v1916_v62 = vadd.f32 %v1891_v28, %v1688_v59  ;;  %v1884_v3 = vsel %vm941_vm3, %v1858_v33, %v1872_v18  ;;  %v1905_v35 = vsel %vm941_vm3, %v1872_v18, %v1830_v15 }
 0x360   :  { %v1917_v45 = vadd.f32 %v1884_v3, %v1793_v1  ;;  %v1918_v41 = vadd.f32 %v1905_v35, %v1795_v56  ;;  %v1587_v15 = vsel %vm621_vm2, %v4158_v44, %v4164_v31  ;;  %v1602_v59 = vsel %vm621_vm2, %v4170_v50, %v4168_v22 }
 0x361   :  { %v1832_v11 = vpop.permute.xlu1 %1831  ;;  %v1944_v61 = vadd.f32 %v1916_v62, %v3222_v29  ;;  %v1943_v42 = vadd.f32 %v1915_v27, %v3222_v29  ;;  %v1588_v63 = vsel %vm621_vm2, %v4166_v7, %v4172_v6  ;;  %v1609_v18 = vsel %vm621_vm2, %v4172_v6, %v4170_v50 }
 0x362   :  { %v1860_v51 = vpop.permute.xlu0 %1859  ;;  %v1946_v8 = vadd.f32 %v1918_v41, %v3222_v29  ;;  %v1945_v48 = vadd.f32 %v1917_v45, %v3222_v29  ;;  %v1799_v29 = vadd.f32 %v4080_v0, %v1587_v15  ;;  %v1698_v22 = vadd.f32 %v4088_v25, %v1602_v59  ;;  %v4505_v59 = vld [vmem:[#allocation9_spill] sm:$0xff] }
 0x363   :  { %2102 = vmatprep.mubr.f32.mxu0 %v1944_v61  ;;  %v1700_v27 = vadd.f32 %v4094_v5, %v1595_v14  ;;  %v1807_v3 = vadd.f32 %v4096_v38, %v1609_v18  ;;  %v1610_v15 = vsel %vm621_vm2, %v4180_v17, %v4178_v21 }
 0x364   :  { %2103 = vmatmul.mubr.f32.gmra.mrb[86].mxu0 %v1943_v42  ;;  %2202 = vmatprep.mubr.f32.mxu1 %v1946_v8  ;;  %v1603_v42 = vsel %vm621_vm2, %v4178_v21, %v4176_v16 }
 0x365   :  { %2203 = vmatmul.mubr.f32.gmra.mrb[86].mxu1 %v1945_v48  ;;  %v1846_v55 = vpop.permute.xlu1 %1845  ;;  %v1589_v48 = vsel %vm621_vm2, %v4174_v26, %v4180_v17  ;;  %v1704_v16 = vadd.f32 %v4100_v20, %v1603_v42  ;;  %v4512_v42 = vld [vmem:[#allocation17_spill] sm:$0xff] }
 0x366   :  { %v1892_v44 = vsel %vm941_vm3, %v1846_v55, %v1860_v51  ;;  %v1899_v33 = vsel %vm941_vm3, %v1832_v11, %v1846_v55  ;;  %v1874_v37 = vpop.permute.xlu0 %1873 }
 0x367   :  { %v1919_v31 = vadd.f32 %v1899_v33, %v1692_v49  ;;  %v1920_v53 = vadd.f32 %v1892_v44, %v1694_v60  ;;  %v1885_v57 = vsel %vm941_vm3, %v1860_v51, %v1874_v37  ;;  %v1906_v24 = vsel %vm941_vm3, %v1874_v37, %v1832_v11 }
 0x368   :  { %v1921_v58 = vadd.f32 %v1885_v57, %v1799_v29  ;;  %v1922_v47 = vadd.f32 %v1906_v24, %v1801_v43  ;;  %v1813_v60 = vadd.f32 %v4108_v40, %v1610_v15 }
 0x369   :  { %v1834_v0 = vpop.permute.xlu1 %1833  ;;  %v1948_v4 = vadd.f32 %v1920_v53, %v3231_v30  ;;  %v1947_v2 = vadd.f32 %v1919_v31, %v3231_v30  ;;  %v1604_v31 = vsel %vm621_vm2, %v4186_v52, %v4184_v23  ;;  %v1590_v53 = vsel %vm621_vm2, %v4182_v12, %v4188_v13 }
 0x36a   :  { %v1862_v1 = vpop.permute.xlu0 %1861  ;;  %v1950_v56 = vadd.f32 %v1922_v47, %v3231_v30  ;;  %v1949_v28 = vadd.f32 %v1921_v58, %v3231_v30  ;;  %v1805_v30 = vadd.f32 %v4092_v34, %v1588_v63  ;;  %v1611_v47 = vsel %vm621_vm2, %v4188_v13, %v4186_v52 }
 0x36b   :  { %2107 = vmatprep.mubr.f32.mxu0 %v1948_v4  ;;  %v4504_v4 = vld [vmem:[#allocation15_spill] sm:$0xff] }
 0x36c   :  { %2108 = vmatmul.mubr.f32.gmra.mrb[88].mxu0 %v1947_v2  ;;  %2207 = vmatprep.mubr.f32.mxu1 %v1950_v56  ;;  %v1817_v2 = vadd.f32 %v4504_v4, %v1590_v53 }
 0x36d   :  { %2208 = vmatmul.mubr.f32.gmra.mrb[88].mxu1 %v1949_v28  ;;  %v1848_v62 = vpop.permute.xlu1 %1847  ;;  %v4507_v28 = vld [vmem:[#allocation16_spill] sm:$0xff] }
 0x36e   :  { %v1893_v7 = vsel %vm941_vm3, %v1848_v62, %v1862_v1  ;;  %v1900_v35 = vsel %vm941_vm3, %v1834_v0, %v1848_v62  ;;  %v1876_v50 = vpop.permute.xlu0 %1875  ;;  %v1591_v10 = vsel %vm621_vm2, %v4507_v28, %v4512_v42 }
 0x36f   :  { %v1923_v6 = vadd.f32 %v1900_v35, %v1698_v22  ;;  %v1924_v45 = vadd.f32 %v1893_v7, %v1700_v27  ;;  %v1886_v25 = vsel %vm941_vm3, %v1862_v1, %v1876_v50  ;;  %v1907_v5 = vsel %vm941_vm3, %v1876_v50, %v1834_v0  ;;  %v4503_v0 = vld [vmem:[#allocation3_spill] sm:$0xff]  ;;  %v4506_v1 = vld [vmem:[#allocation12_spill] sm:$0xff] }
 0x370   :  { %v1925_v41 = vadd.f32 %v1886_v25, %v1805_v30  ;;  %v1926_v11 = vadd.f32 %v1907_v5, %v1807_v3  ;;  %v1819_v56 = vadd.f32 %v4506_v1, %v1611_v47  ;;  %v4509_v50 = vld [vmem:[#allocation11_spill] sm:$0xff] }
 0x371   :  { %v1836_v34 = vpop.permute.xlu1 %1835  ;;  %v1952_v38 = vadd.f32 %v1924_v45, %v3238_v32  ;;  %v1951_v61 = vadd.f32 %v1923_v6, %v3238_v32  ;;  %v4510_v25 = vld [vmem:[#allocation7_spill] sm:$0xff] }
 0x372   :  { %v1864_v36 = vpop.permute.xlu0 %1863  ;;  %v1954_v51 = vadd.f32 %v1926_v11, %v3238_v32  ;;  %v1953_v8 = vadd.f32 %v1925_v41, %v3238_v32  ;;  %v1811_v32 = vadd.f32 %v4104_v39, %v1589_v48  ;;  %v1597_v39 = vsel %vm621_vm2, %v4184_v23, %v4182_v12  ;;  %v4511_v41 = vld [vmem:[#allocation4_spill] sm:$0xff]  ;;  %v4513_v48 = vld [vmem:[#allocation14_spill] sm:$0xff] }
 0x373   :  { %2112 = vmatprep.mubr.f32.mxu0 %v1952_v38  ;;  %v1710_v23 = vadd.f32 %v4503_v0, %v1604_v31  ;;  %v1712_v14 = vadd.f32 %v4505_v59, %v1597_v39  ;;  %v2032_v31 = vstv %s4440_s4 }
 0x374   :  { %2113 = vmatmul.mubr.f32.gmra.mrb[90].mxu0 %v1951_v61  ;;  %2212 = vmatprep.mubr.f32.mxu1 %v1954_v51 }
 0x375   :  { %2213 = vmatmul.mubr.f32.gmra.mrb[90].mxu1 %v1953_v8  ;;  %v1850_v49 = vpop.permute.xlu1 %1849 }
 0x376   :  { %v1894_v26 = vsel %vm941_vm3, %v1850_v49, %v1864_v36  ;;  %v1901_v55 = vsel %vm941_vm3, %v1836_v34, %v1850_v49  ;;  %v1878_v21 = vpop.permute.xlu0 %1877 }
 0x377   :  { %v1927_v17 = vadd.f32 %v1901_v55, %v1704_v16  ;;  %v1928_v29 = vadd.f32 %v1894_v26, %v1706_v46  ;;  %v1887_v20 = vsel %vm941_vm3, %v1864_v36, %v1878_v21  ;;  %v1908_v9 = vsel %vm941_vm3, %v1878_v21, %v1836_v34  ;;  %v4514_v46 = vld [vmem:[#allocation13_spill] sm:$0xff]  ;;  %v4516_v21 = vld [vmem:[#allocation10_spill] sm:$0xff] }
 0x378   :  { %v1929_v43 = vadd.f32 %v1887_v20, %v1811_v32  ;;  %v1930_v44 = vadd.f32 %v1908_v9, %v1813_v60  ;;  %v1612_v36 = vsel %vm621_vm2, %v4512_v42, %v4510_v25  ;;  %v1823_v49 = vadd.f32 %v4514_v46, %v1591_v10  ;;  %v4515_v32 = vld [vmem:[#allocation18_spill] sm:$0xff] }
 0x379   :  { %v1838_v40 = vpop.permute.xlu1 %1837  ;;  %v1956_v33 = vadd.f32 %v1928_v29, %v4476_v19  ;;  %v1955_v37 = vadd.f32 %v1927_v17, %v4476_v19  ;;  %v1825_v60 = vadd.f32 %v4515_v32, %v1612_v36 }
 0x37a   :  { %v1866_v57 = vpop.permute.xlu0 %1865  ;;  %v1958_v24 = vadd.f32 %v1930_v44, %v4476_v19  ;;  %v1957_v58 = vadd.f32 %v1929_v43, %v4476_v19  ;;  %v4508_v19 = vld [vmem:[#allocation6_spill] sm:$0xff] }
 0x37b   :  { %2117 = vmatprep.mubr.f32.mxu0 %v1956_v33  ;;  %v1598_v63 = vsel %vm621_vm2, %v4508_v19, %v4507_v28  ;;  %v1605_v5 = vsel %vm621_vm2, %v4510_v25, %v4508_v19 }
 0x37c   :  { %2118 = vmatmul.mubr.f32.gmra.mrb[92].mxu0 %v1955_v37  ;;  %2217 = vmatprep.mubr.f32.mxu1 %v1958_v24  ;;  %v1718_v11 = vadd.f32 %v4511_v41, %v1598_v63  ;;  %v1716_v15 = vadd.f32 %v4513_v48, %v1605_v5 }
 0x37d   :  { %2218 = vmatmul.mubr.f32.gmra.mrb[92].mxu1 %v1957_v58  ;;  %v1852_v12 = vpop.permute.xlu1 %1851 }
 0x37e   :  { %v1895_v52 = vsel %vm941_vm3, %v1852_v12, %v1866_v57  ;;  %v1902_v13 = vsel %vm941_vm3, %v1838_v40, %v1852_v12  ;;  %v1880_v18 = vpop.permute.xlu0 %1879 }
 0x37f   :  { %v1931_v22 = vadd.f32 %v1902_v13, %v1710_v23  ;;  %v1932_v27 = vadd.f32 %v1895_v52, %v1712_v14  ;;  %v1888_v62 = vsel %vm941_vm3, %v1866_v57, %v1880_v18  ;;  %v1909_v30 = vsel %vm941_vm3, %v1880_v18, %v1838_v40 }
 0x380   :  { %v1933_v3 = vadd.f32 %v1888_v62, %v1817_v2  ;;  %v1934_v7 = vadd.f32 %v1909_v30, %v1819_v56 }
 0x381   :  { %v1854_v35 = vpop.permute.xlu1 %1853  ;;  %v1960_v6 = vadd.f32 %v1932_v27, %v4509_v50  ;;  %v1959_v45 = vadd.f32 %v1931_v22, %v4509_v50 }
 0x382   :  { %v1868_v34 = vpop.permute.xlu0 %1867  ;;  %v1962_v38 = vadd.f32 %v1934_v7, %v4509_v50  ;;  %v1961_v61 = vadd.f32 %v1933_v3, %v4509_v50 }
 0x383   :  { %v1896_v51 = vsel %vm941_vm3, %v1854_v35, %v1868_v34  ;;  %2122 = vmatprep.mubr.f32.mxu0 %v1960_v6 }
 0x384   :  { %v1936_v8 = vadd.f32 %v1896_v51, %v1718_v11  ;;  %2123 = vmatmul.mubr.f32.gmra.mrb[94].mxu0 %v1959_v45  ;;  %2222 = vmatprep.mubr.f32.mxu1 %v1962_v38 }
 0x385   :  { %2223 = vmatmul.mubr.f32.gmra.mrb[94].mxu1 %v1961_v61  ;;  %v1840_v16 = vpop.permute.xlu1 %1839 }
 0x386   :  { %v1903_v26 = vsel %vm941_vm3, %v1840_v16, %v1854_v35  ;;  %v1882_v55 = vpop.permute.xlu0 %1881  ;;  %v1964_v17 = vadd.f32 %v1936_v8, %v4516_v21 }
 0x387   :  { %v1935_v29 = vadd.f32 %v1903_v26, %v1716_v15  ;;  %v1889_v20 = vsel %vm941_vm3, %v1868_v34, %v1882_v55  ;;  %v1910_v9 = vsel %vm941_vm3, %v1882_v55, %v1840_v16 }
 0x388   :  { %v1937_v43 = vadd.f32 %v1889_v20, %v1823_v49  ;;  %v1938_v44 = vadd.f32 %v1910_v9, %v1825_v60  ;;  %2127 = vmatprep.mubr.f32.mxu0 %v1964_v17 }
 0x389   :  { %v1963_v39 = vadd.f32 %v1935_v29, %v4516_v21 }
 0x38a   :  { %v1966_v40 = vadd.f32 %v1938_v44, %v4516_v21  ;;  %v1965_v33 = vadd.f32 %v1937_v43, %v4516_v21 }
 0x38b   :  { %2128 = vmatmul.mubr.f32.gmra.mrb[96].mxu0 %v1963_v39 }
 0x38c   :  { %2227 = vmatprep.mubr.f32.mxu1 %v1966_v40 }
 0x38d   :  { %2228 = vmatmul.mubr.f32.gmra.mrb[96].mxu1 %v1965_v33 }
 0x42f   :  { %v2400_v37 = vpop.f32.mrb[84].mxu0 }
 0x430   :  { %v2401_v53 = vpop.f32.mrb[85].mxu0  ;;  %v2453_v54 = vpop.f32.mrb[84].mxu1 }
 0x431   :  { %v2402_v57 = vadd.f32 %v2401_v53, %v2400_v37  ;;  %v2454_v24 = vpop.f32.mrb[85].mxu1 }
 0x432   :  { %v2455_v58 = vadd.f32 %v2454_v24, %v2453_v54 }
 0x433   :  { %v2100_v47 = vadd.f32 %v2402_v57, %v2032_v31 }
 0x435   :  { %v2200_v0 = vadd.f32 %v2455_v58, %v2100_v47 }
 0x437   :  { %2234 = vst.msk [vmem:[%s4441_s5] sm:$0xff] %vm2233_vm4, %v2200_v0  ;;  %v2403_v23 = vpop.f32.mrb[86].mxu0 }
 0x438   :  { %v2404_v4 = vpop.f32.mrb[87].mxu0  ;;  %v2456_v2 = vpop.f32.mrb[86].mxu1 }
 0x439   :  { %v2405_v59 = vadd.f32 %v2404_v4, %v2403_v23  ;;  %v2457_v14 = vpop.f32.mrb[87].mxu1 }
 0x43a   :  { %v2458_v12 = vadd.f32 %v2457_v14, %v2456_v2 }
 0x43b   :  { %v2105_v1 = vadd.f32 %v2405_v59, %v2032_v31 }
 0x43d   :  { %v2205_v56 = vadd.f32 %v2458_v12, %v2105_v1 }
 0x43f   :  { %2235 = vst.msk [vmem:[%s4441_s5 + $0x8] sm:$0xff] %vm2233_vm4, %v2205_v56  ;;  %v2406_v28 = vpop.f32.mrb[88].mxu0 }
 0x440   :  { %v2407_v19 = vpop.f32.mrb[89].mxu0  ;;  %v2459_v63 = vpop.f32.mrb[88].mxu1 }
 0x441   :  { %v2408_v52 = vadd.f32 %v2407_v19, %v2406_v28  ;;  %v2460_v13 = vpop.f32.mrb[89].mxu1 }
 0x442   :  { %v2461_v18 = vadd.f32 %v2460_v13, %v2459_v63 }
 0x443   :  { %v2110_v22 = vadd.f32 %v2408_v52, %v2032_v31 }
 0x445   :  { %v2210_v27 = vadd.f32 %v2461_v18, %v2110_v22 }
 0x447   :  { %2236 = vst.msk [vmem:[%s4441_s5 + $0x10] sm:$0xff] %vm2233_vm4, %v2210_v27  ;;  %v2409_v62 = vpop.f32.mrb[90].mxu0 }
 0x448   :  { %v2410_v30 = vpop.f32.mrb[91].mxu0  ;;  %v2462_v3 = vpop.f32.mrb[90].mxu1 }
 0x449   :  { %v2411_v7 = vadd.f32 %v2410_v30, %v2409_v62  ;;  %v2463_v35 = vpop.f32.mrb[91].mxu1 }
 0x44a   :  { %v2464_v50 = vadd.f32 %v2463_v35, %v2462_v3 }
 0x44b   :  { %v2115_v6 = vadd.f32 %v2411_v7, %v2032_v31 }
 0x44d   :  { %v2215_v45 = vadd.f32 %v2464_v50, %v2115_v6 }
 0x44f   :  { %2237 = vst.msk [vmem:[%s4441_s5 + $0x18] sm:$0xff] %vm2233_vm4, %v2215_v45  ;;  %v2412_v25 = vpop.f32.mrb[92].mxu0 }
 0x450   :  { %v2413_v5 = vpop.f32.mrb[93].mxu0  ;;  %v2465_v41 = vpop.f32.mrb[92].mxu1 }
 0x451   :  { %v2414_v11 = vadd.f32 %v2413_v5, %v2412_v25  ;;  %v2466_v34 = vpop.f32.mrb[93].mxu1 }
 0x452   :  { %v2467_v38 = vadd.f32 %v2466_v34, %v2465_v41 }
 0x453   :  { %v2120_v61 = vadd.f32 %v2414_v11, %v2032_v31 }
 0x455   :  { %v2220_v42 = vadd.f32 %v2467_v38, %v2120_v61 }
 0x457   :  { %2238 = vst.msk [vmem:[%s4441_s5 + $0x20] sm:$0xff] %vm2233_vm4, %v2220_v42  ;;  %v2415_v10 = vpop.f32.mrb[94].mxu0 }
 0x458   :  { %v2416_v36 = vpop.f32.mrb[95].mxu0  ;;  %v2468_v51 = vpop.f32.mrb[94].mxu1 }
 0x459   :  { %v2417_v8 = vadd.f32 %v2416_v36, %v2415_v10  ;;  %v2469_v48 = vpop.f32.mrb[95].mxu1 }
 0x45a   :  { %v2470_v15 = vadd.f32 %v2469_v48, %v2468_v51 }
 0x45b   :  { %v2125_v16 = vadd.f32 %v2417_v8, %v2032_v31 }
 0x45d   :  { %v2225_v46 = vadd.f32 %v2470_v15, %v2125_v16 }
 0x45e   :  { %v2418_v49 = vpop.f32.mrb[96].mxu0 }
 0x45f   :  { %2239 = vst.msk [vmem:[%s4441_s5 + $0x28] sm:$0xff] %vm2233_vm4, %v2225_v46  ;;  %v2419_v32 = vpop.f32.mrb[97].mxu0 }
 0x460   :  { %v2420_v60 = vadd.f32 %v2419_v32, %v2418_v49  ;;  %v2471_v26 = vpop.f32.mrb[96].mxu1 }
 0x461   :  { %v2472_v55 = vpop.f32.mrb[97].mxu1 }
 0x462   :  { %v2130_v21 = vadd.f32 %v2420_v60, %v2032_v31  ;;  %v2473_v17 = vadd.f32 %v2472_v55, %v2471_v26 }
 0x464   :  { %v2230_v29 = vadd.f32 %v2473_v17, %v2130_v21 }
 0x466   :  { %2241 = vst.msk [vmem:[%s4441_s5 + $0x30] sm:$0x3] %vm2240_vm5, %v2230_v29 }

</bundles_post_ra>
